<compile_context>
chip_gen: v7x
topology: tpu7x:2x2x1
jax: 0.10.0
libtpu: 0.0.40
codegen_flags: <defaults>
</compile_context>

<pallas_src>
import jax
import jax.numpy as jnp
from jax import lax
from jax.experimental import pallas as pl
from jax.experimental.pallas import tpu as pltpu

# ---------------- model hyper-params (small, consistent with the module) ----
B, S = 2, 8            # batch, sequence length
VOCAB, EMB = 50, 16    # vocab size, embedding size
HIDDEN = 32            # encoder hidden size
KSIZE = 5              # conv kernel size
NUM_CLASSES = 3
PAD = KSIZE // 2

NB = 2 * B             # stacked premise+hypothesis sequences (= 4)
NBP = 8                # ... padded to a full sublane tile (rows 4..7 dummy)
L = 16                 # per-sequence row-block length (power of 2, >= S+2*PAD)
OFF = 4                # real tokens live at rows [OFF, OFF+S) of each block
R = NBP * L            # total rows processed by the kernel (= 128)
OUT_LANES = 128        # lane-dense output width (>= NUM_CLASSES)
SENTINEL = VOCAB       # out-of-range id -> all-zero one-hot -> zero embedding

# Roll-wrap invariant (re-verify if S / KSIZE / L / OFF change): every valid
# output row p (pos(p) in [OFF, OFF+S)) only reads rows p-PAD..p+PAD, which
# must stay inside that sequence's own L-row block so the circular
# pltpu.roll never feeds another sequence (or wrap-around garbage) into a
# valid row.
assert PAD <= OFF and OFF + S + PAD <= L, "roll wrap-around would reach valid rows"
assert L % 8 == 0 and (L & (L - 1)) == 0, "L must be a power-of-two multiple of 8"
assert NB <= NBP and NBP % 8 == 0


# --------------------------- fused forward kernel ---------------------------
def _cnn_fwd_kernel(ids_ref, t1_ref, b1_ref, w2_ref, b2_ref, wl_ref, bl_ref,
                    out_ref):
    # ---- one-hot over the sentinel-padded token rows (sentinel -> all zero)
    vocab_iota = lax.broadcasted_iota(jnp.int32, (R, VOCAB), 1)
    onehot = (ids_ref[...] == vocab_iota).astype(jnp.float32)        # (R, V)

    # ---- valid-position mask: rows outside [OFF, OFF+S) of each L-row block
    #      act as the zero padding of both 'same' convolutions.
    row = lax.broadcasted_iota(jnp.int32, (R, HIDDEN), 0)
    pos = row & (L - 1)                                              # row % L
    valid = (pos >= OFF) & (pos < OFF + S)

    def conv_same(x, w_taps_ref, b_ref):
        """1-D 'same' conv: per-tap matmul + sublane roll-accumulate + ReLU."""
        acc = None
        for t in range(KSIZE):
            u = jnp.dot(x, w_taps_ref[t], preferred_element_type=jnp.float32)
            shift = (PAD - t) % R          # row p takes tap t from row p+t-PAD
            if shift:
                u = pltpu.roll(u, shift, axis=0)      # sublane rotation (XLU)
            acc = u if acc is None else acc + u
        return jnp.maximum(acc + b_ref[...], 0.0)

    # conv1 (embedding folded into the tap weights) -> ReLU -> zero pad rows
    h1 = conv_same(onehot, t1_ref, b1_ref)                           # (R, H)
    h1 = jnp.where(valid, h1, 0.0)
    # conv2 -> ReLU -> mask so max-pool only sees the S real positions
    h2 = conv_same(h1, w2_ref, b2_ref)                               # (R, H)
    h2 = jnp.where(valid, h2, 0.0)

    # ---- max-pool over the sequence: (NBP, L, H) -> (NBP, H)
    enc = jnp.max(h2.reshape(NBP, L, HIDDEN), axis=1)

    # ---- head: joint softmax over [premise | hypothesis], then Linear(2H->C)
    # rows [0, B) of `enc` are premise encodings, rows [B, 2B) hypothesis.
    # Align hypothesis rows on top with a sublane roll (no misaligned row
    # slices); output rows >= B are junk and never read by the caller.
    eh = pltpu.roll(enc, NBP - B, axis=0)                            # (NBP, H)
    m = jnp.maximum(jnp.max(enc, axis=1, keepdims=True),
                    jnp.max(eh, axis=1, keepdims=True))
    ex_p = jnp.exp(enc - m)
    ex_h = jnp.exp(eh - m)
    inv = 1.0 / (jnp.sum(ex_p, axis=1, keepdims=True)
                 + jnp.sum(ex_h, axis=1, keepdims=True))             # exact
    logits = (jnp.dot(ex_p * inv, wl_ref[0], preferred_element_type=jnp.float32)
              + jnp.dot(ex_h * inv, wl_ref[1], preferred_element_type=jnp.float32)
              + bl_ref[...])                                         # (NBP, 128)
    out_ref[...] = logits.astype(out_ref.dtype)                      # full-tile store


@jax.jit
def _cnn_forward(t1, b1_row, w2k, b2_row, wl_pad, bl_pad, prem, hypo):
    # Single tiny input fusion: scatter the 2B real sequences into the padded
    # (NBP, L) row grid (sentinel elsewhere) and pre-broadcast over VOCAB
    # lanes so the in-kernel one-hot compare needs no relayout.
    tokens = jnp.concatenate([prem, hypo], axis=0).astype(jnp.int32)  # (NB, S)
    ids = jnp.full((NBP, L), SENTINEL, dtype=jnp.int32)
    ids = ids.at[:NB, OFF:OFF + S].set(tokens)
    ids_bcast = jnp.broadcast_to(ids.reshape(R, 1), (R, VOCAB))

    vmem = pl.BlockSpec(memory_space=pltpu.MemorySpace.VMEM)
    out = pl.pallas_call(
        _cnn_fwd_kernel,
        out_shape=jax.ShapeDtypeStruct((NBP, OUT_LANES), jnp.float32),
        in_specs=[vmem] * 7,
        out_specs=vmem,
        # grid=() -> single TensorCore; right call for B=2.  On v7x, add a
        # parallel batch grid axis only when running at real batch sizes.
    )(ids_bcast, t1, b1_row, w2k, b2_row, wl_pad, bl_pad)
    return out[:B, :NUM_CLASSES]


# ------------------------------ full model ----------------------------------
class CNNModelPallas:
    def __init__(self, key):
        ks = jax.random.split(key, 7)

        def uinit(k, shape, fan_in):
            bound = 1.0 / jnp.sqrt(jnp.float32(fan_in))
            return jax.random.uniform(k, shape, jnp.float32, -bound, bound)

        # "pretrained" embedding table (synthetic)
        self.embedding = jax.random.normal(ks[0], (VOCAB, EMB), jnp.float32)
        # Conv1d weights in PyTorch (O, I, K) layout
        self.w1_oik = uinit(ks[1], (HIDDEN, EMB, KSIZE), EMB * KSIZE)
        self.b1 = uinit(ks[2], (HIDDEN,), EMB * KSIZE)
        self.w2_oik = uinit(ks[3], (HIDDEN, HIDDEN, KSIZE), HIDDEN * KSIZE)
        self.b2 = uinit(ks[4], (HIDDEN,), HIDDEN * KSIZE)
        # Linear(2H -> C): PyTorch weight is (C, 2H)
        self.wl = uinit(ks[5], (NUM_CLASSES, 2 * HIDDEN), 2 * HIDDEN)
        self.bl = uinit(ks[6], (NUM_CLASSES,), 2 * HIDDEN)

        hi = jax.lax.Precision.HIGHEST
        # Embedding folded into conv1: T1[t] = embedding @ W1_t^T   (V, H)
        self.t1 = jnp.stack(
            [jnp.matmul(self.embedding, self.w1_oik[:, :, t].T, precision=hi)
             for t in range(KSIZE)], axis=0)                        # (K, V, H)
        # conv2 tap weights, (input, output) layout per tap
        self.w2k = jnp.stack([self.w2_oik[:, :, t].T for t in range(KSIZE)],
                             axis=0)                                # (K, H, H)
        self.b1_row = self.b1[None, :]
        self.b2_row = self.b2[None, :]
        # Linear weight split into premise/hypothesis halves, zero-padded to a
        # lane-dense 128-wide output.
        wl_t = self.wl.T                                            # (2H, C)
        wl_pad = jnp.zeros((2, HIDDEN, OUT_LANES), jnp.float32)
        wl_pad = wl_pad.at[0, :, :NUM_CLASSES].set(wl_t[:HIDDEN])
        wl_pad = wl_pad.at[1, :, :NUM_CLASSES].set(wl_t[HIDDEN:])
        self.wl_pad = wl_pad
        self.bl_pad = jnp.zeros((1, OUT_LANES), jnp.float32)
        self.bl_pad = self.bl_pad.at[0, :NUM_CLASSES].set(self.bl)

    def forward(self, prem, hypo, p_len=None, h_len=None):
        # p_len / h_len unused, as in the original forward
        return _cnn_forward(self.t1, self.b1_row, self.w2k, self.b2_row,
                            self.wl_pad, self.bl_pad, prem, hypo)

    # pure-JAX reference for validation
    def forward_ref(self, prem, hypo):
        def enc(x_emb):
            x = jnp.transpose(x_emb, (0, 2, 1))                # (B, E, S)
            h = jax.lax.conv_general_dilated(
                x, self.w1_oik, (1,), [(PAD, PAD)],
                dimension_numbers=("NCH", "OIH", "NCH"))
            h = jnp.maximum(h + self.b1[None, :, None], 0.0)
            h = jax.lax.conv_general_dilated(
                h, self.w2_oik, (1,), [(PAD, PAD)],
                dimension_numbers=("NCH", "OIH", "NCH"))
            h = jnp.maximum(h + self.b2[None, :, None], 0.0)
            return jnp.max(h, axis=2)                          # (B, H)

        premise = enc(jnp.take(self.embedding, prem, axis=0))
        hypothesis = enc(jnp.take(self.embedding, hypo, axis=0))
        cat = jnp.concatenate([premise, hypothesis], axis=1)
        p = jax.nn.softmax(cat, axis=1)
        return p @ self.wl.T + self.bl[None, :]


if __name__ == "__main__":
    key = jax.random.PRNGKey(0)
    k_model, k_prem, k_hypo = jax.random.split(key, 3)

    model = CNNModelPallas(k_model)
    prem = jax.random.randint(k_prem, (B, S), 0, VOCAB, dtype=jnp.int32)
    hypo = jax.random.randint(k_hypo, (B, S), 0, VOCAB, dtype=jnp.int32)
    p_len = jnp.full((B,), S, dtype=jnp.int32)
    h_len = jnp.full((B,), S, dtype=jnp.int32)

    scores = jax.block_until_ready(model.forward(prem, hypo, p_len, h_len))

    ref = jax.block_until_ready(model.forward_ref(prem, hypo))
    assert scores.shape == (B, NUM_CLASSES)
    assert jnp.allclose(scores, ref, atol=1e-4, rtol=1e-4), (scores, ref)

    print("KERNEL_OK")
</pallas_src>

<mosaic_0001>
module attributes {stable_mosaic.version = 11 : i64} {
  func.func @_cnn_fwd_kernel(%arg0: memref<128x50xi32, #tpu.memory_space<vmem>>, %arg1: memref<5x50x32xf32, #tpu.memory_space<vmem>>, %arg2: memref<1x32xf32, #tpu.memory_space<vmem>>, %arg3: memref<5x32x32xf32, #tpu.memory_space<vmem>>, %arg4: memref<1x32xf32, #tpu.memory_space<vmem>>, %arg5: memref<2x32x128xf32, #tpu.memory_space<vmem>>, %arg6: memref<1x128xf32, #tpu.memory_space<vmem>>, %arg7: memref<8x128xf32, #tpu.memory_space<vmem>>) attributes {dimension_semantics = [], scalar_prefetch = 0 : i64, scratch_operands = 0 : i64, tpu.core_type = #tpu.core_type<tc>} {
    %0 = tpu.iota {dimensions = array<i32: 1>} : vector<128x50xi32>
    %c0 = arith.constant 0 : index
    %c0_0 = arith.constant 0 : index
    %1 = vector.load %arg0[%c0, %c0_0] : memref<128x50xi32, #tpu.memory_space<vmem>>, vector<128x50xi32>
    %2 = arith.cmpi eq, %1, %0 : vector<128x50xi32>
    %3 = arith.extui %2 : vector<128x50xi1> to vector<128x50xi32>
    %4 = arith.sitofp %3 : vector<128x50xi32> to vector<128x50xf32>
    %5 = tpu.iota {dimensions = array<i32: 0>} : vector<128x32xi32>
    %c15_i32 = arith.constant 15 : i32
    %6 = vector.broadcast %c15_i32 : i32 to vector<128x32xi32>
    %7 = arith.andi %5, %6 : vector<128x32xi32>
    %c4_i32 = arith.constant 4 : i32
    %8 = vector.broadcast %c4_i32 : i32 to vector<128x32xi32>
    %9 = arith.cmpi sge, %7, %8 : vector<128x32xi32>
    %c12_i32 = arith.constant 12 : i32
    %10 = vector.broadcast %c12_i32 : i32 to vector<128x32xi32>
    %11 = arith.cmpi slt, %7, %10 : vector<128x32xi32>
    %12 = arith.andi %9, %11 : vector<128x32xi1>
    %c0_1 = arith.constant 0 : index
    %c0_2 = arith.constant 0 : index
    %c0_3 = arith.constant 0 : index
    %13 = vector.load %arg1[%c0_1, %c0_2, %c0_3] : memref<5x50x32xf32, #tpu.memory_space<vmem>>, vector<1x50x32xf32>
    %14 = vector.shape_cast %13 : vector<1x50x32xf32> to vector<50x32xf32>
    %cst = arith.constant dense<0.000000e+00> : vector<128x32xf32>
    %15 = tpu.matmul %4, %14, %cst {dimension_numbers = #tpu.dot_dimension_numbers<[1], [0], [0], [1], [0, 0, 1, 1], [], []>} : vector<128x50xf32>, vector<50x32xf32>, vector<128x32xf32> -> vector<128x32xf32>
    %c2_i32 = arith.constant 2 : i32
    %16 = tpu.dynamic_rotate %15 by %c2_i32 dim 0 : vector<128x32xf32>, i32 -> vector<128x32xf32>
    %c1 = arith.constant 1 : index
    %c0_4 = arith.constant 0 : index
    %c0_5 = arith.constant 0 : index
    %17 = vector.load %arg1[%c1, %c0_4, %c0_5] : memref<5x50x32xf32, #tpu.memory_space<vmem>>, vector<1x50x32xf32>
    %18 = vector.shape_cast %17 : vector<1x50x32xf32> to vector<50x32xf32>
    %cst_6 = arith.constant dense<0.000000e+00> : vector<128x32xf32>
    %19 = tpu.matmul %4, %18, %cst_6 {dimension_numbers = #tpu.dot_dimension_numbers<[1], [0], [0], [1], [0, 0, 1, 1], [], []>} : vector<128x50xf32>, vector<50x32xf32>, vector<128x32xf32> -> vector<128x32xf32>
    %c1_i32 = arith.constant 1 : i32
    %20 = tpu.dynamic_rotate %19 by %c1_i32 dim 0 : vector<128x32xf32>, i32 -> vector<128x32xf32>
    %21 = arith.addf %16, %20 : vector<128x32xf32>
    %c2 = arith.constant 2 : index
    %c0_7 = arith.constant 0 : index
    %c0_8 = arith.constant 0 : index
    %22 = vector.load %arg1[%c2, %c0_7, %c0_8] : memref<5x50x32xf32, #tpu.memory_space<vmem>>, vector<1x50x32xf32>
    %23 = vector.shape_cast %22 : vector<1x50x32xf32> to vector<50x32xf32>
    %cst_9 = arith.constant dense<0.000000e+00> : vector<128x32xf32>
    %24 = tpu.matmul %4, %23, %cst_9 {dimension_numbers = #tpu.dot_dimension_numbers<[1], [0], [0], [1], [0, 0, 1, 1], [], []>} : vector<128x50xf32>, vector<50x32xf32>, vector<128x32xf32> -> vector<128x32xf32>
    %25 = arith.addf %21, %24 : vector<128x32xf32>
    %c3 = arith.constant 3 : index
    %c0_10 = arith.constant 0 : index
    %c0_11 = arith.constant 0 : index
    %26 = vector.load %arg1[%c3, %c0_10, %c0_11] : memref<5x50x32xf32, #tpu.memory_space<vmem>>, vector<1x50x32xf32>
    %27 = vector.shape_cast %26 : vector<1x50x32xf32> to vector<50x32xf32>
    %cst_12 = arith.constant dense<0.000000e+00> : vector<128x32xf32>
    %28 = tpu.matmul %4, %27, %cst_12 {dimension_numbers = #tpu.dot_dimension_numbers<[1], [0], [0], [1], [0, 0, 1, 1], [], []>} : vector<128x50xf32>, vector<50x32xf32>, vector<128x32xf32> -> vector<128x32xf32>
    %c127_i32 = arith.constant 127 : i32
    %29 = tpu.dynamic_rotate %28 by %c127_i32 dim 0 : vector<128x32xf32>, i32 -> vector<128x32xf32>
    %30 = arith.addf %25, %29 : vector<128x32xf32>
    %c4 = arith.constant 4 : index
    %c0_13 = arith.constant 0 : index
    %c0_14 = arith.constant 0 : index
    %31 = vector.load %arg1[%c4, %c0_13, %c0_14] : memref<5x50x32xf32, #tpu.memory_space<vmem>>, vector<1x50x32xf32>
    %32 = vector.shape_cast %31 : vector<1x50x32xf32> to vector<50x32xf32>
    %cst_15 = arith.constant dense<0.000000e+00> : vector<128x32xf32>
    %33 = tpu.matmul %4, %32, %cst_15 {dimension_numbers = #tpu.dot_dimension_numbers<[1], [0], [0], [1], [0, 0, 1, 1], [], []>} : vector<128x50xf32>, vector<50x32xf32>, vector<128x32xf32> -> vector<128x32xf32>
    %c126_i32 = arith.constant 126 : i32
    %34 = tpu.dynamic_rotate %33 by %c126_i32 dim 0 : vector<128x32xf32>, i32 -> vector<128x32xf32>
    %35 = arith.addf %30, %34 : vector<128x32xf32>
    %c0_16 = arith.constant 0 : index
    %c0_17 = arith.constant 0 : index
    %36 = vector.load %arg2[%c0_16, %c0_17] : memref<1x32xf32, #tpu.memory_space<vmem>>, vector<1x32xf32>
    %37 = vector.broadcast %36 : vector<1x32xf32> to vector<128x32xf32>
    %38 = arith.addf %35, %37 : vector<128x32xf32>
    %cst_18 = arith.constant 0.000000e+00 : f32
    %39 = vector.broadcast %cst_18 : f32 to vector<128x32xf32>
    %40 = arith.maximumf %38, %39 : vector<128x32xf32>
    %cst_19 = arith.constant 0.000000e+00 : f32
    %41 = vector.broadcast %cst_19 : f32 to vector<128x32xf32>
    %42 = arith.select %12, %40, %41 : vector<128x32xi1>, vector<128x32xf32>
    %c0_20 = arith.constant 0 : index
    %c0_21 = arith.constant 0 : index
    %c0_22 = arith.constant 0 : index
    %43 = vector.load %arg3[%c0_20, %c0_21, %c0_22] : memref<5x32x32xf32, #tpu.memory_space<vmem>>, vector<1x32x32xf32>
    %44 = vector.shape_cast %43 : vector<1x32x32xf32> to vector<32x32xf32>
    %cst_23 = arith.constant dense<0.000000e+00> : vector<128x32xf32>
    %45 = tpu.matmul %42, %44, %cst_23 {dimension_numbers = #tpu.dot_dimension_numbers<[1], [0], [0], [1], [0, 0, 1, 1], [], []>} : vector<128x32xf32>, vector<32x32xf32>, vector<128x32xf32> -> vector<128x32xf32>
    %c2_i32_24 = arith.constant 2 : i32
    %46 = tpu.dynamic_rotate %45 by %c2_i32_24 dim 0 : vector<128x32xf32>, i32 -> vector<128x32xf32>
    %c1_25 = arith.constant 1 : index
    %c0_26 = arith.constant 0 : index
    %c0_27 = arith.constant 0 : index
    %47 = vector.load %arg3[%c1_25, %c0_26, %c0_27] : memref<5x32x32xf32, #tpu.memory_space<vmem>>, vector<1x32x32xf32>
    %48 = vector.shape_cast %47 : vector<1x32x32xf32> to vector<32x32xf32>
    %cst_28 = arith.constant dense<0.000000e+00> : vector<128x32xf32>
    %49 = tpu.matmul %42, %48, %cst_28 {dimension_numbers = #tpu.dot_dimension_numbers<[1], [0], [0], [1], [0, 0, 1, 1], [], []>} : vector<128x32xf32>, vector<32x32xf32>, vector<128x32xf32> -> vector<128x32xf32>
    %c1_i32_29 = arith.constant 1 : i32
    %50 = tpu.dynamic_rotate %49 by %c1_i32_29 dim 0 : vector<128x32xf32>, i32 -> vector<128x32xf32>
    %51 = arith.addf %46, %50 : vector<128x32xf32>
    %c2_30 = arith.constant 2 : index
    %c0_31 = arith.constant 0 : index
    %c0_32 = arith.constant 0 : index
    %52 = vector.load %arg3[%c2_30, %c0_31, %c0_32] : memref<5x32x32xf32, #tpu.memory_space<vmem>>, vector<1x32x32xf32>
    %53 = vector.shape_cast %52 : vector<1x32x32xf32> to vector<32x32xf32>
    %cst_33 = arith.constant dense<0.000000e+00> : vector<128x32xf32>
    %54 = tpu.matmul %42, %53, %cst_33 {dimension_numbers = #tpu.dot_dimension_numbers<[1], [0], [0], [1], [0, 0, 1, 1], [], []>} : vector<128x32xf32>, vector<32x32xf32>, vector<128x32xf32> -> vector<128x32xf32>
    %55 = arith.addf %51, %54 : vector<128x32xf32>
    %c3_34 = arith.constant 3 : index
    %c0_35 = arith.constant 0 : index
    %c0_36 = arith.constant 0 : index
    %56 = vector.load %arg3[%c3_34, %c0_35, %c0_36] : memref<5x32x32xf32, #tpu.memory_space<vmem>>, vector<1x32x32xf32>
    %57 = vector.shape_cast %56 : vector<1x32x32xf32> to vector<32x32xf32>
    %cst_37 = arith.constant dense<0.000000e+00> : vector<128x32xf32>
    %58 = tpu.matmul %42, %57, %cst_37 {dimension_numbers = #tpu.dot_dimension_numbers<[1], [0], [0], [1], [0, 0, 1, 1], [], []>} : vector<128x32xf32>, vector<32x32xf32>, vector<128x32xf32> -> vector<128x32xf32>
    %c127_i32_38 = arith.constant 127 : i32
    %59 = tpu.dynamic_rotate %58 by %c127_i32_38 dim 0 : vector<128x32xf32>, i32 -> vector<128x32xf32>
    %60 = arith.addf %55, %59 : vector<128x32xf32>
    %c4_39 = arith.constant 4 : index
    %c0_40 = arith.constant 0 : index
    %c0_41 = arith.constant 0 : index
    %61 = vector.load %arg3[%c4_39, %c0_40, %c0_41] : memref<5x32x32xf32, #tpu.memory_space<vmem>>, vector<1x32x32xf32>
    %62 = vector.shape_cast %61 : vector<1x32x32xf32> to vector<32x32xf32>
    %cst_42 = arith.constant dense<0.000000e+00> : vector<128x32xf32>
    %63 = tpu.matmul %42, %62, %cst_42 {dimension_numbers = #tpu.dot_dimension_numbers<[1], [0], [0], [1], [0, 0, 1, 1], [], []>} : vector<128x32xf32>, vector<32x32xf32>, vector<128x32xf32> -> vector<128x32xf32>
    %c126_i32_43 = arith.constant 126 : i32
    %64 = tpu.dynamic_rotate %63 by %c126_i32_43 dim 0 : vector<128x32xf32>, i32 -> vector<128x32xf32>
    %65 = arith.addf %60, %64 : vector<128x32xf32>
    %c0_44 = arith.constant 0 : index
    %c0_45 = arith.constant 0 : index
    %66 = vector.load %arg4[%c0_44, %c0_45] : memref<1x32xf32, #tpu.memory_space<vmem>>, vector<1x32xf32>
    %67 = vector.broadcast %66 : vector<1x32xf32> to vector<128x32xf32>
    %68 = arith.addf %65, %67 : vector<128x32xf32>
    %cst_46 = arith.constant 0.000000e+00 : f32
    %69 = vector.broadcast %cst_46 : f32 to vector<128x32xf32>
    %70 = arith.maximumf %68, %69 : vector<128x32xf32>
    %cst_47 = arith.constant 0.000000e+00 : f32
    %71 = vector.broadcast %cst_47 : f32 to vector<128x32xf32>
    %72 = arith.select %12, %70, %71 : vector<128x32xi1>, vector<128x32xf32>
    %73 = vector.shape_cast %72 : vector<128x32xf32> to vector<8x16x32xf32>
    %cst_48 = arith.constant dense<0xFF800000> : vector<8x32xf32>
    %74 = vector.multi_reduction <maximumf>, %73, %cst_48 [1] : vector<8x16x32xf32> to vector<8x32xf32>
    %c6_i32 = arith.constant 6 : i32
    %75 = tpu.dynamic_rotate %74 by %c6_i32 dim 0 : vector<8x32xf32>, i32 -> vector<8x32xf32>
    %cst_49 = arith.constant dense<0xFF800000> : vector<8xf32>
    %76 = vector.multi_reduction <maximumf>, %74, %cst_49 [1] : vector<8x32xf32> to vector<8xf32>
    %77 = vector.shape_cast %76 : vector<8xf32> to vector<8x1xf32>
    %cst_50 = arith.constant dense<0xFF800000> : vector<8xf32>
    %78 = vector.multi_reduction <maximumf>, %75, %cst_50 [1] : vector<8x32xf32> to vector<8xf32>
    %79 = vector.shape_cast %78 : vector<8xf32> to vector<8x1xf32>
    %80 = arith.maximumf %77, %79 : vector<8x1xf32>
    %81 = vector.broadcast %80 : vector<8x1xf32> to vector<8x32xf32>
    %82 = arith.subf %74, %81 : vector<8x32xf32>
    %83 = math.exp %82 : vector<8x32xf32>
    %84 = vector.broadcast %80 : vector<8x1xf32> to vector<8x32xf32>
    %85 = arith.subf %75, %84 : vector<8x32xf32>
    %86 = math.exp %85 : vector<8x32xf32>
    %cst_51 = arith.constant dense<0.000000e+00> : vector<8xf32>
    %87 = vector.multi_reduction <add>, %83, %cst_51 [1] : vector<8x32xf32> to vector<8xf32>
    %88 = vector.shape_cast %87 : vector<8xf32> to vector<8x1xf32>
    %cst_52 = arith.constant dense<0.000000e+00> : vector<8xf32>
    %89 = vector.multi_reduction <add>, %86, %cst_52 [1] : vector<8x32xf32> to vector<8xf32>
    %90 = vector.shape_cast %89 : vector<8xf32> to vector<8x1xf32>
    %91 = arith.addf %88, %90 : vector<8x1xf32>
    %cst_53 = arith.constant 1.000000e+00 : f32
    %92 = vector.broadcast %cst_53 : f32 to vector<8x1xf32>
    %93 = arith.divf %92, %91 : vector<8x1xf32>
    %94 = vector.broadcast %93 : vector<8x1xf32> to vector<8x32xf32>
    %95 = arith.mulf %83, %94 : vector<8x32xf32>
    %c0_54 = arith.constant 0 : index
    %c0_55 = arith.constant 0 : index
    %c0_56 = arith.constant 0 : index
    %96 = vector.load %arg5[%c0_54, %c0_55, %c0_56] : memref<2x32x128xf32, #tpu.memory_space<vmem>>, vector<1x32x128xf32>
    %97 = vector.shape_cast %96 : vector<1x32x128xf32> to vector<32x128xf32>
    %cst_57 = arith.constant dense<0.000000e+00> : vector<8x128xf32>
    %98 = tpu.matmul %95, %97, %cst_57 {dimension_numbers = #tpu.dot_dimension_numbers<[1], [0], [0], [1], [0, 0, 1, 1], [], []>} : vector<8x32xf32>, vector<32x128xf32>, vector<8x128xf32> -> vector<8x128xf32>
    %99 = vector.broadcast %93 : vector<8x1xf32> to vector<8x32xf32>
    %100 = arith.mulf %86, %99 : vector<8x32xf32>
    %c1_58 = arith.constant 1 : index
    %c0_59 = arith.constant 0 : index
    %c0_60 = arith.constant 0 : index
    %101 = vector.load %arg5[%c1_58, %c0_59, %c0_60] : memref<2x32x128xf32, #tpu.memory_space<vmem>>, vector<1x32x128xf32>
    %102 = vector.shape_cast %101 : vector<1x32x128xf32> to vector<32x128xf32>
    %cst_61 = arith.constant dense<0.000000e+00> : vector<8x128xf32>
    %103 = tpu.matmul %100, %102, %cst_61 {dimension_numbers = #tpu.dot_dimension_numbers<[1], [0], [0], [1], [0, 0, 1, 1], [], []>} : vector<8x32xf32>, vector<32x128xf32>, vector<8x128xf32> -> vector<8x128xf32>
    %104 = arith.addf %98, %103 : vector<8x128xf32>
    %c0_62 = arith.constant 0 : index
    %c0_63 = arith.constant 0 : index
    %105 = vector.load %arg6[%c0_62, %c0_63] : memref<1x128xf32, #tpu.memory_space<vmem>>, vector<1x128xf32>
    %106 = vector.broadcast %105 : vector<1x128xf32> to vector<8x128xf32>
    %107 = arith.addf %104, %106 : vector<8x128xf32>
    %c0_64 = arith.constant 0 : index
    %c0_65 = arith.constant 0 : index
    %108 = vector.load %arg7[%c0_64, %c0_65] : memref<8x128xf32, #tpu.memory_space<vmem>>, vector<8x128xf32>
    tpu.vector_store %arg7[%c0_64, %c0_65], %107 {strides = array<i32>} : memref<8x128xf32, #tpu.memory_space<vmem>>, vector<8x128xf32>,
    return
  }
}

</mosaic_0001>

<bundles_post_ra>
// kernel: _cnn_forward.1
= control target key start
LH: loop header
LB: loop body
LE: loop exit
PB: predicated region body
PF: predicated region fallthrough
CT: control target
= control target key end

     0   :  { %v26_v0 = vlaneseq  ;;  %vm180_vm0 = vcmask 408576   ;;  %v3656_v21 = vmov 0.0   ;;  %vm229_vm2 = vcmask 1041408   ;;  %s5109_s1 = inlined_call_operand.vmem [shape: f32[5,50,32], index: 1, kind: input, shape index: {}]   ;;  %s5110_s0 = inlined_call_operand.vmem [shape: s32[128,50], index: 0, kind: input, shape index: {}]   ;;  %s5111_s3 = inlined_call_operand.vmem [shape: f32[5,32,32], index: 3, kind: input, shape index: {}]   ;;  %s5112_s2 = inlined_call_operand.vmem [shape: f32[1,32], index: 2, kind: input, shape index: {}]   ;;  %s5113_s4 = inlined_call_operand.vmem [shape: f32[1,32], index: 4, kind: input, shape index: {}]   ;;  %s5114_s5 = inlined_call_operand.vmem [shape: f32[2,32,128], index: 5, kind: input, shape index: {}]   ;;  %s5115_s6 = inlined_call_operand.vmem [shape: f32[1,128], index: 6, kind: input, shape index: {}]   ;;  %s5116_s7 = inlined_call_operand.vmem [shape: f32[8,128], index: 7, kind: output, shape index: {}]  }
   0x1   :  { %v173_v1 = vld [vmem:[%s5109_s1] sm:$0xff]  ;;  %v174_v2 = vld [vmem:[%s5109_s1 + $0x8] sm:$0xff]  ;;  %v2723_v3 = vld [vmem:[%s5109_s1 + $0x38] sm:$0xff] }
   0x2   :  { %v3521_v4 = vpack.c.bf16 %v174_v2, %v173_v1  ;;  %v2724_v5 = vld [vmem:[%s5109_s1 + $0x40] sm:$0xff]  ;;  %v175_v6 = vld [vmem:[%s5109_s1 + $0x10] sm:$0xff]  ;;  %v176_v7 = vld [vmem:[%s5109_s1 + $0x18] sm:$0xff]  ;;  %v3718_v8 = vand.u32 127, %v26_v0 }
   0x3   :  { %v3533_v9 = vpack.c.bf16 %v2724_v5, %v2723_v3  ;;  %v3525_v10 = vpack.c.bf16 %v176_v7, %v175_v6  ;;  %v2725_v11 = vld [vmem:[%s5109_s1 + $0x48] sm:$0xff]  ;;  %v2726_v12 = vld [vmem:[%s5109_s1 + $0x50] sm:$0xff]  ;;  %v177_v13 = vld [vmem:[%s5109_s1 + $0x20] sm:$0xff] }
   0x4   :  { %3522 = vmatprep.subr.bf16.mxu0 %v3521_v4  ;;  %v3537_v14 = vpack.c.bf16 %v2726_v12, %v2725_v11  ;;  %v178_v15 = vld [vmem:[%s5109_s1 + $0x28] sm:$0xff]  ;;  %v2727_v16 = vld [vmem:[%s5109_s1 + $0x58] sm:$0xff]  ;;  %v2728_v17 = vld [vmem:[%s5109_s1 + $0x60] sm:$0xff] }
   0x5   :  { %3534 = vmatprep.subr.bf16.mxu1 %v3533_v9  ;;  %3524 = vmatpush3.bf16.msra.mxu0 %v3521_v4  ;;  %v28_v18 = vld [vmem:[%s5110_s0] sm:$0xff]  ;;  %v3529_v19 = vpack.c.bf16 %v178_v15, %v177_v13  ;;  %v3541_v20 = vpack.c.bf16 %v2728_v17, %v2727_v16  ;;  %v29_v23 = vld [vmem:[%s5110_s0 + $0x8] sm:$0xff]  ;;  %v179_v24 = vld [vmem:[%s5109_s1 + $0x30] sm:$0x3] }
   0x6   :  { %3536 = vmatpush3.bf16.msra.mxu1 %v3533_v9  ;;  %3526 = vmatprep.subr.bf16.mxu0 %v3525_v10  ;;  %vm44_vm1 = vcmp.eq.s32.totalorder %v28_v18, %v3718_v8  ;;  %v30_v25 = vld [vmem:[%s5110_s0 + $0x10] sm:$0xff]  ;;  %v2729_v26 = vld [vmem:[%s5109_s1 + $0x68] sm:$0x3]  ;;  %vm45_vm3 = vcmp.eq.s32.totalorder %v29_v23, %v3718_v8  ;;  %v2748_v28 = vld [vmem:[%s5109_s1 + $0x78] sm:$0xff] }
   0x7   :  { %3538 = vmatprep.subr.bf16.mxu1 %v3537_v14  ;;  %v3743_v22 = vsel %vm44_vm1, 1.0, %v3656_v21  ;;  %v2747_v27 = vld [vmem:[%s5109_s1 + $0x70] sm:$0xff]  ;;  %v31_v29 = vld [vmem:[%s5110_s0 + $0x18] sm:$0xff]  ;;  %vm46_vm4 = vcmp.eq.s32.totalorder %v30_v25, %v3718_v8  ;;  %v32_v30 = vld [vmem:[%s5110_s0 + $0x20] sm:$0xff]  ;;  %v3784_v33 = vsel %vm45_vm3, 1.0, %v3656_v21 }
   0x8   :  { %3163 = vmatprep.mubr.msk.f32.mxu0 %vm180_vm0, %v3743_v22  ;;  %3201 = vmatprep.mubr.msk.f32.mxu1 %vm180_vm0, %v3743_v22  ;;  %v2749_v31 = vld [vmem:[%s5109_s1 + $0x80] sm:$0xff]  ;;  %v2750_v32 = vld [vmem:[%s5109_s1 + $0x88] sm:$0xff]  ;;  %v3545_v34 = vpack.c.bf16 %v2748_v28, %v2747_v27  ;;  %v2772_v36 = vld [vmem:[%s5109_s1 + $0xb0] sm:$0xff]  ;;  %vm47_vm5 = vcmp.eq.s32.totalorder %v31_v29, %v3718_v8  ;;  %v3795_v37 = vsel %vm46_vm4, 1.0, %v3656_v21  ;;  %vm48_vm6 = vcmp.eq.s32.totalorder %v32_v30, %v3718_v8 }
   0x9   :  { %3528 = vmatpush3.bf16.msra.mxu0 %v3525_v10  ;;  %v2771_v35 = vld [vmem:[%s5109_s1 + $0xa8] sm:$0xff]  ;;  %v3549_v39 = vpack.c.bf16 %v2750_v32, %v2749_v31  ;;  %v34_v40 = vld [vmem:[%s5110_s0 + $0x30] sm:$0xff]  ;;  %v2752_v42 = vld [vmem:[%s5109_s1 + $0x98] sm:$0xff]  ;;  %v3816_v44 = vsel %vm47_vm5, 1.0, %v3656_v21  ;;  %v3829_v47 = vsel %vm48_vm6, 1.0, %v3656_v21 }
   0xa   :  { %3540 = vmatpush3.bf16.msra.mxu1 %v3537_v14  ;;  %3530 = vmatprep.subr.bf16.mxu0 %v3529_v19  ;;  %v33_v38 = vld [vmem:[%s5110_s0 + $0x28] sm:$0xff]  ;;  %v2751_v41 = vld [vmem:[%s5109_s1 + $0x90] sm:$0xff]  ;;  %v3557_v43 = vpack.c.bf16 %v2772_v36, %v2771_v35  ;;  %v2773_v45 = vld [vmem:[%s5109_s1 + $0xb8] sm:$0xff]  ;;  %vm50_vm8 = vcmp.eq.s32.totalorder %v34_v40, %v3718_v8 }
   0xb   :  { %3542 = vmatprep.subr.bf16.mxu1 %v3541_v20  ;;  %v2774_v46 = vld [vmem:[%s5109_s1 + $0xc0] sm:$0xff]  ;;  %vm49_vm7 = vcmp.eq.s32.totalorder %v33_v38, %v3718_v8  ;;  %v35_v48 = vld [vmem:[%s5110_s0 + $0x38] sm:$0xff]  ;;  %v3553_v49 = vpack.c.bf16 %v2752_v42, %v2751_v41  ;;  %v2775_v53 = vld [vmem:[%s5109_s1 + $0xc8] sm:$0xff]  ;;  %v3859_v55 = vsel %vm50_vm8, 1.0, %v3656_v21  ;;  %v4134_v41 = vshrl.u32 %v26_v0, 7 }
   0xc   :  { %v36_v50 = vld [vmem:[%s5110_s0 + $0x40] sm:$0xff]  ;;  %v3561_v51 = vpack.c.bf16 %v2774_v46, %v2773_v45  ;;  %v3848_v52 = vsel %vm49_vm7, 1.0, %v3656_v21  ;;  %v2776_v54 = vld [vmem:[%s5109_s1 + $0xd0] sm:$0xff]  ;;  %vm51_vm9 = vcmp.eq.s32.totalorder %v35_v48, %v3718_v8  ;;  %v37_v56 = vld [vmem:[%s5110_s0 + $0x48] sm:$0xff]  ;;  %vm5123_vm7 = vcmask 261120  }
   0xd   :  { %3532 = vmatpush3.bf16.msra.mxu0 %v3529_v19  ;;  %vm52_vm10 = vcmp.eq.s32.totalorder %v36_v50, %v3718_v8  ;;  %v38_v57 = vld [vmem:[%s5110_s0 + $0x50] sm:$0xff]  ;;  %v2753_v58 = vld [vmem:[%s5109_s1 + $0xa0] sm:$0x3]  ;;  %v3565_v59 = vpack.c.bf16 %v2776_v54, %v2775_v53  ;;  %v2796_v61 = vld [vmem:[%s5109_s1 + $0xe8] sm:$0xff]  ;;  %v3885_v62 = vsel %vm51_vm9, 1.0, %v3656_v21  ;;  %vm53_vm11 = vcmp.eq.s32.totalorder %v37_v56, %v3718_v8 }
   0xe   :  { %3544 = vmatpush3.bf16.msra.mxu1 %v3541_v20  ;;  %3161 = vmatprep.subr.msk.mxu0 %vm229_vm2, %v179_v24  ;;  %v2795_v60 = vld [vmem:[%s5109_s1 + $0xe0] sm:$0xff]  ;;  %v3890_v63 = vsel %vm52_vm10, 1.0, %v3656_v21  ;;  %vm54_vm12 = vcmp.eq.s32.totalorder %v38_v57, %v3718_v8  ;;  %v39_v1 = vld [vmem:[%s5110_s0 + $0x58] sm:$0xff]  ;;  %v3908_v4 = vsel %vm53_vm11, 1.0, %v3656_v21  ;;  %v41_v7 = vld [vmem:[%s5110_s0 + $0x68] sm:$0xff]  ;;  %vm5117_vm4 = vcmp.lt.s32.totalorder %v4134_v41, 7 }
   0xf   :  { %3199 = vmatprep.subr.msk.mxu1 %vm229_vm2, %v2729_v26  ;;  %v3569_v2 = vpack.c.bf16 %v2796_v61, %v2795_v60  ;;  %v40_v3 = vld [vmem:[%s5110_s0 + $0x60] sm:$0xff]  ;;  %v2777_v5 = vld [vmem:[%s5109_s1 + $0xd8] sm:$0x3]  ;;  %v3916_v6 = vsel %vm54_vm12, 1.0, %v3656_v21  ;;  %vm55_vm13 = vcmp.eq.s32.totalorder %v39_v1, %v3718_v8  ;;  %v42_v9 = vld [vmem:[%s5110_s0 + $0x70] sm:$0xff]  ;;  %vm57_vm15 = vcmp.eq.s32.totalorder %v41_v7, %v3718_v8 }
  0x10   :  { %vm56_vm14 = vcmp.eq.s32.totalorder %v40_v3, %v3718_v8  ;;  %v3935_v10 = vsel %vm55_vm13, 1.0, %v3656_v21  ;;  %vm58_vm1 = vcmp.eq.s32.totalorder %v42_v9, %v3718_v8  ;;  %v43_v12 = vld [vmem:[%s5110_s0 + $0x78] sm:$0xff]  ;;  %v3955_v13 = vsel %vm57_vm15, 1.0, %v3656_v21  ;;  %v2799_v18 = vld [vmem:[%s5109_s1 + $0x100] sm:$0xff]  ;;  %v2800_v19 = vld [vmem:[%s5109_s1 + $0x108] sm:$0xff] }
  0x11   :  { %3162 = vmatpush3.msk.msra.mxu0 %vm229_vm2, %v179_v24  ;;  %v3940_v11 = vsel %vm56_vm14, 1.0, %v3656_v21  ;;  %v3960_v14 = vsel %vm58_vm1, 1.0, %v3656_v21  ;;  %vm59_vm3 = vcmp.eq.s32.totalorder %v43_v12, %v3718_v8  ;;  %v2797_v8 = vld [vmem:[%s5109_s1 + $0xf0] sm:$0xff]  ;;  %v2798_v16 = vld [vmem:[%s5109_s1 + $0xf8] sm:$0xff]  ;;  %v3577_v20 = vpack.c.bf16 %v2800_v19, %v2799_v18  ;;  %v1254_v24 = vld [vmem:[%s5111_s3 + $0x8] sm:$0xff] }
  0x12   :  { %3200 = vmatpush3.msk.msra.mxu1 %vm229_vm2, %v2729_v26  ;;  %3164 = vmatmul.mubr.msk.f32.vlgmr.msra.gmra.mrb[0].mxu0 %vm180_vm0, %v3784_v33  ;;  %v3970_v15 = vsel %vm59_vm3, 1.0, %v3656_v21  ;;  %v3573_v17 = vpack.c.bf16 %v2798_v16, %v2797_v8  ;;  %v2801_v23 = vld [vmem:[%s5109_s1 + $0x110] sm:$0x3]  ;;  %v1256_v27 = vld [vmem:[%s5111_s3 + $0x18] sm:$0xff]  ;;  %v2836_v29 = vld [vmem:[%s5111_s3 + $0x20] sm:$0xff]  ;;  %vm5119_vm5 = vcmp.lt.s32.totalorder %v4134_v41, 6 }
  0x13   :  { %3202 = vmatmul.mubr.msk.f32.vlgmr.msra.gmra.mrb[0].mxu1 %vm180_vm0, %v3784_v33  ;;  %3546 = vmatprep.subr.bf16.mxu0 %v3545_v34  ;;  %v1255_v26 = vld [vmem:[%s5111_s3 + $0x10] sm:$0xff]  ;;  %v2837_v30 = vld [vmem:[%s5111_s3 + $0x28] sm:$0xff]  ;;  %v2856_v35 = vld [vmem:[%s5111_s3 + $0x40] sm:$0xff] }
  0x14   :  { %3548 = vmatpush3.bf16.msra.mxu0 %v3545_v34  ;;  %3166 = vmatprep.mubr.msk.f32.mxu0 %vm180_vm0, %v3795_v37  ;;  %v3585_v28 = vpack.c.bf16 %v1256_v27, %v1255_v26  ;;  %v3589_v31 = vpack.c.bf16 %v2837_v30, %v2836_v29  ;;  %v2838_v32 = vld [vmem:[%s5111_s3 + $0x30] sm:$0xff]  ;;  %v2857_v36 = vld [vmem:[%s5111_s3 + $0x48] sm:$0xff]  ;;  %v2876_v38 = vld [vmem:[%s5111_s3 + $0x60] sm:$0xff] }
  0x15   :  { %3204 = vmatprep.mubr.msk.f32.mxu1 %vm180_vm0, %v3795_v37  ;;  %3550 = vmatprep.subr.bf16.mxu0 %v3549_v39 }
  0x16   :  { %3167 = vmatmul.mubr.msk.f32.gmra.mrb[2].mxu0 %vm180_vm0, %v3816_v44  ;;  %3558 = vmatprep.subr.bf16.mxu1 %v3557_v43 }
  0x17   :  { %3205 = vmatmul.mubr.msk.f32.gmra.mrb[2].mxu1 %vm180_vm0, %v3816_v44  ;;  %3169 = vmatprep.mubr.msk.f32.mxu0 %vm180_vm0, %v3829_v47 }
  0x18   :  { %3207 = vmatprep.mubr.msk.f32.mxu1 %vm180_vm0, %v3829_v47  ;;  %3552 = vmatpush3.bf16.msra.mxu0 %v3549_v39  ;;  %v2877_v39 = vld [vmem:[%s5111_s3 + $0x68] sm:$0xff] }
  0x19   :  { %3554 = vmatprep.subr.bf16.mxu0 %v3553_v49  ;;  %3560 = vmatpush3.bf16.msra.mxu1 %v3557_v43  ;;  %v4130_v40 = vpack.c.bf16 %v2877_v39, %v2876_v38 }
  0x1a   :  { %3170 = vmatmul.mubr.msk.f32.gmra.mrb[4].mxu0 %vm180_vm0, %v3848_v52  ;;  %3562 = vmatprep.subr.bf16.mxu1 %v3561_v51 }
  0x1b   :  { %3208 = vmatmul.mubr.msk.f32.gmra.mrb[4].mxu1 %vm180_vm0, %v3848_v52  ;;  %3172 = vmatprep.mubr.msk.f32.mxu0 %vm180_vm0, %v3859_v55 }
  0x1c   :  { %3210 = vmatprep.mubr.msk.f32.mxu1 %vm180_vm0, %v3859_v55  ;;  %3556 = vmatpush3.bf16.msra.mxu0 %v3553_v49 }
  0x1d   :  { %3564 = vmatpush3.bf16.msra.mxu1 %v3561_v51  ;;  %3237 = vmatprep.subr.msk.mxu0 %vm229_vm2, %v2753_v58 }
  0x1e   :  { %3173 = vmatmul.mubr.msk.f32.gmra.mrb[6].mxu0 %vm180_vm0, %v3885_v62  ;;  %3566 = vmatprep.subr.bf16.mxu1 %v3565_v59 }
  0x1f   :  { %3211 = vmatmul.mubr.msk.f32.gmra.mrb[6].mxu1 %vm180_vm0, %v3885_v62  ;;  %3175 = vmatprep.mubr.msk.f32.mxu0 %vm180_vm0, %v3890_v63 }
  0x20   :  { %3213 = vmatprep.mubr.msk.f32.mxu1 %vm180_vm0, %v3890_v63  ;;  %3238 = vmatpush3.msk.msra.mxu0 %vm229_vm2, %v2753_v58 }
  0x21   :  { %3568 = vmatpush3.bf16.msra.mxu1 %v3565_v59  ;;  %3570 = vmatprep.subr.bf16.mxu0 %v3569_v2 }
  0x22   :  { %3176 = vmatmul.mubr.msk.f32.gmra.mrb[8].mxu0 %vm180_vm0, %v3908_v4  ;;  %3275 = vmatprep.subr.msk.mxu1 %vm229_vm2, %v2777_v5 }
  0x23   :  { %3214 = vmatmul.mubr.msk.f32.gmra.mrb[8].mxu1 %vm180_vm0, %v3908_v4  ;;  %3178 = vmatprep.mubr.msk.f32.mxu0 %vm180_vm0, %v3916_v6 }
  0x24   :  { %3216 = vmatprep.mubr.msk.f32.mxu1 %vm180_vm0, %v3916_v6 }
  0x25   :  { %3276 = vmatpush3.msk.msra.mxu1 %vm229_vm2, %v2777_v5 }
  0x26   :  { %3179 = vmatmul.mubr.msk.f32.gmra.mrb[10].mxu0 %vm180_vm0, %v3935_v10 }
  0x27   :  { %3217 = vmatmul.mubr.msk.f32.gmra.mrb[10].mxu1 %vm180_vm0, %v3935_v10  ;;  %3181 = vmatprep.mubr.msk.f32.mxu0 %vm180_vm0, %v3940_v11 }
  0x28   :  { %3219 = vmatprep.mubr.msk.f32.mxu1 %vm180_vm0, %v3940_v11 }
  0x2a   :  { %3182 = vmatmul.mubr.msk.f32.gmra.mrb[12].mxu0 %vm180_vm0, %v3955_v13 }
  0x2b   :  { %3220 = vmatmul.mubr.msk.f32.gmra.mrb[12].mxu1 %vm180_vm0, %v3955_v13  ;;  %3184 = vmatprep.mubr.msk.f32.mxu0 %vm180_vm0, %v3960_v14 }
  0x2c   :  { %3222 = vmatprep.mubr.msk.f32.mxu1 %vm180_vm0, %v3960_v14 }
  0x2e   :  { %3185 = vmatmul.mubr.msk.f32.gmra.mrb[14].mxu0 %vm180_vm0, %v3970_v15 }
  0x2f   :  { %3223 = vmatmul.mubr.msk.f32.gmra.mrb[14].mxu1 %vm180_vm0, %v3970_v15  ;;  %3239 = vmatprep.mubr.msk.f32.mxu0 %vm180_vm0, %v3743_v22 }
  0x30   :  { %3277 = vmatprep.mubr.msk.f32.mxu1 %vm180_vm0, %v3743_v22 }
  0x32   :  { %3240 = vmatmul.mubr.msk.f32.vlgmr.msra.gmra.mrb[16].mxu0 %vm180_vm0, %v3784_v33 }
  0x33   :  { %3278 = vmatmul.mubr.msk.f32.vlgmr.msra.gmra.mrb[16].mxu1 %vm180_vm0, %v3784_v33  ;;  %3572 = vmatpush3.bf16.msra.mxu0 %v3569_v2 }
  0x34   :  { %3242 = vmatprep.mubr.msk.f32.mxu0 %vm180_vm0, %v3795_v37  ;;  %3280 = vmatprep.mubr.msk.f32.mxu1 %vm180_vm0, %v3795_v37 }
  0x35   :  { %3574 = vmatprep.subr.bf16.mxu0 %v3573_v17 }
  0x36   :  { %3243 = vmatmul.mubr.msk.f32.gmra.mrb[18].mxu0 %vm180_vm0, %v3816_v44 }
  0x37   :  { %3281 = vmatmul.mubr.msk.f32.gmra.mrb[18].mxu1 %vm180_vm0, %v3816_v44  ;;  %3245 = vmatprep.mubr.msk.f32.mxu0 %vm180_vm0, %v3829_v47 }
  0x38   :  { %3283 = vmatprep.mubr.msk.f32.mxu1 %vm180_vm0, %v3829_v47  ;;  %3576 = vmatpush3.bf16.msra.mxu0 %v3573_v17 }
  0x39   :  { %3578 = vmatprep.subr.bf16.mxu0 %v3577_v20 }
  0x3a   :  { %3246 = vmatmul.mubr.msk.f32.gmra.mrb[20].mxu0 %vm180_vm0, %v3848_v52 }
  0x3b   :  { %3284 = vmatmul.mubr.msk.f32.gmra.mrb[20].mxu1 %vm180_vm0, %v3848_v52  ;;  %3248 = vmatprep.mubr.msk.f32.mxu0 %vm180_vm0, %v3859_v55 }
  0x3c   :  { %3286 = vmatprep.mubr.msk.f32.mxu1 %vm180_vm0, %v3859_v55  ;;  %3580 = vmatpush3.bf16.msra.mxu0 %v3577_v20 }
  0x3d   :  { %3313 = vmatprep.subr.msk.mxu0 %vm229_vm2, %v2801_v23 }
  0x3e   :  { %3249 = vmatmul.mubr.msk.f32.gmra.mrb[22].mxu0 %vm180_vm0, %v3885_v62 }
  0x3f   :  { %3287 = vmatmul.mubr.msk.f32.gmra.mrb[22].mxu1 %vm180_vm0, %v3885_v62  ;;  %3251 = vmatprep.mubr.msk.f32.mxu0 %vm180_vm0, %v3890_v63 }
  0x40   :  { %3289 = vmatprep.mubr.msk.f32.mxu1 %vm180_vm0, %v3890_v63  ;;  %3314 = vmatpush3.msk.msra.mxu0 %vm229_vm2, %v2801_v23  ;;  %vm5118_vm2 = vcmp.lt.s32.totalorder %v4134_v41, 1 }
  0x41   :  { %3590 = vmatprep.subr.bf16.mxu0 %v3589_v31 }
  0x42   :  { %3252 = vmatmul.mubr.msk.f32.gmra.mrb[24].mxu0 %vm180_vm0, %v3908_v4 }
  0x43   :  { %3290 = vmatmul.mubr.msk.f32.gmra.mrb[24].mxu1 %vm180_vm0, %v3908_v4  ;;  %3254 = vmatprep.mubr.msk.f32.mxu0 %vm180_vm0, %v3916_v6 }
  0x44   :  { %3292 = vmatprep.mubr.msk.f32.mxu1 %vm180_vm0, %v3916_v6 }
  0x46   :  { %3255 = vmatmul.mubr.msk.f32.gmra.mrb[26].mxu0 %vm180_vm0, %v3935_v10 }
  0x47   :  { %3293 = vmatmul.mubr.msk.f32.gmra.mrb[26].mxu1 %vm180_vm0, %v3935_v10  ;;  %3257 = vmatprep.mubr.msk.f32.mxu0 %vm180_vm0, %v3940_v11 }
  0x48   :  { %3295 = vmatprep.mubr.msk.f32.mxu1 %vm180_vm0, %v3940_v11 }
  0x4a   :  { %3258 = vmatmul.mubr.msk.f32.gmra.mrb[28].mxu0 %vm180_vm0, %v3955_v13 }
  0x4b   :  { %3296 = vmatmul.mubr.msk.f32.gmra.mrb[28].mxu1 %vm180_vm0, %v3955_v13  ;;  %3260 = vmatprep.mubr.msk.f32.mxu0 %vm180_vm0, %v3960_v14 }
  0x4c   :  { %3298 = vmatprep.mubr.msk.f32.mxu1 %vm180_vm0, %v3960_v14 }
  0x4e   :  { %3261 = vmatmul.mubr.msk.f32.gmra.mrb[30].mxu0 %vm180_vm0, %v3970_v15 }
  0x4f   :  { %3299 = vmatmul.mubr.msk.f32.gmra.mrb[30].mxu1 %vm180_vm0, %v3970_v15  ;;  %3315 = vmatprep.mubr.msk.f32.mxu0 %vm180_vm0, %v3743_v22  ;;  %v1253_v22 = vld [vmem:[%s5111_s3] sm:$0xff] }
  0x50   :  { %v3581_v25 = vpack.c.bf16 %v1254_v24, %v1253_v22 }
  0x52   :  { %3316 = vmatmul.mubr.msk.f32.vlgmr.msra.gmra.mrb[32].mxu0 %vm180_vm0, %v3784_v33  ;;  %3582 = vmatprep.subr.bf16.mxu1 %v3581_v25  ;;  %v2839_v33 = vld [vmem:[%s5111_s3 + $0x38] sm:$0xff] }
  0x53   :  { %3318 = vmatprep.mubr.msk.f32.mxu0 %vm180_vm0, %v3795_v37  ;;  %3584 = vmatpush3.bf16.msra.mxu1 %v3581_v25  ;;  %v3593_v34 = vpack.c.bf16 %v2839_v33, %v2838_v32  ;;  %v4121_v37 = vpack.c.bf16 %v2857_v36, %v2856_v35 }
  0x54   :  { %3586 = vmatprep.subr.bf16.mxu1 %v3585_v28  ;;  %3592 = vmatpush3.bf16.msra.mxu0 %v3589_v31 }
  0x55   :  { %3594 = vmatprep.subr.bf16.mxu0 %v3593_v34 }
  0x56   :  { %3319 = vmatmul.mubr.msk.f32.gmra.mrb[34].mxu0 %vm180_vm0, %v3816_v44 }
  0x57   :  { %3321 = vmatprep.mubr.msk.f32.mxu0 %vm180_vm0, %v3829_v47  ;;  %3588 = vmatpush3.bf16.msra.mxu1 %v3585_v28 }
  0x58   :  { %3596 = vmatpush3.bf16.msra.mxu0 %v3593_v34  ;;  %3598 = vmatprep.subr.bf16.mxu1 %v4121_v37 }
  0x59   :  { %3606 = vmatprep.subr.bf16.mxu0 %v4130_v40 }
  0x5a   :  { %3322 = vmatmul.mubr.msk.f32.gmra.mrb[36].mxu0 %vm180_vm0, %v3848_v52 }
  0x5b   :  { %3324 = vmatprep.mubr.msk.f32.mxu0 %vm180_vm0, %v3859_v55 }
  0x5e   :  { %3325 = vmatmul.mubr.msk.f32.gmra.mrb[38].mxu0 %vm180_vm0, %v3885_v62 }
  0x5f   :  { %3327 = vmatprep.mubr.msk.f32.mxu0 %vm180_vm0, %v3890_v63 }
  0x62   :  { %3328 = vmatmul.mubr.msk.f32.gmra.mrb[40].mxu0 %vm180_vm0, %v3908_v4 }
  0x63   :  { %3330 = vmatprep.mubr.msk.f32.mxu0 %vm180_vm0, %v3916_v6 }
  0x66   :  { %3331 = vmatmul.mubr.msk.f32.gmra.mrb[42].mxu0 %vm180_vm0, %v3935_v10 }
  0x67   :  { %3333 = vmatprep.mubr.msk.f32.mxu0 %vm180_vm0, %v3940_v11 }
  0x6a   :  { %3334 = vmatmul.mubr.msk.f32.gmra.mrb[44].mxu0 %vm180_vm0, %v3955_v13 }
  0x6b   :  { %3336 = vmatprep.mubr.msk.f32.mxu0 %vm180_vm0, %v3960_v14 }
  0x6e   :  { %3337 = vmatmul.mubr.msk.f32.gmra.mrb[46].mxu0 %vm180_vm0, %v3970_v15  ;;  %vm5120_vm0 = vcmp.lt.s32.totalorder %v4134_v41, 2 }
  0xe5   :  { %v3165_v42 = vpop.f32.mrb[0].mxu0 }
  0xe6   :  { %v379_v43 = vrot.slane %v3165_v42, 6  ;;  %v3203_v44 = vpop.f32.mrb[0].mxu1  ;;  %v4136_v45 = vpop.f32.mrb[1].mxu0 }
  0xe7   :  { %v568_v46 = vrot.slane %v3203_v44, 7  ;;  %v378_v47 = vrot.slane %v4136_v45, 6  ;;  %v4140_v48 = vpop.f32.mrb[1].mxu1 }
  0xe8   :  { %v567_v49 = vrot.slane %v4140_v48, 7 }
  0xe9   :  { %v3168_v50 = vpop.f32.mrb[2].mxu0  ;;  %v409_v0 = vsel %vm5120_vm0, %v378_v47, %v379_v43 }
  0xea   :  { %v381_v51 = vrot.slane %v3168_v50, 6  ;;  %v3206_v52 = vpop.f32.mrb[2].mxu1  ;;  %v309_v53 = vpop.f32.mrb[3].mxu0  ;;  %v598_v54 = vsel %vm5118_vm2, %v567_v49, %v568_v46 }
  0xeb   :  { %v570_v55 = vrot.slane %v3206_v52, 7  ;;  %v380_v56 = vrot.slane %v309_v53, 6  ;;  %v498_v57 = vpop.f32.mrb[3].mxu1  ;;  %v4152_v58 = vadd.f32 %v598_v54, %v409_v0 }
  0xec   :  { %v569_v59 = vrot.slane %v498_v57, 7 }
  0xed   :  { %v3171_v60 = vpop.f32.mrb[4].mxu0  ;;  %v407_v61 = vsel %vm5120_vm0, %v380_v56, %v381_v51  ;;  %v408_v62 = vsel %vm5120_vm0, %v379_v43, %v380_v56 }
  0xee   :  { %v383_v63 = vrot.slane %v3171_v60, 6  ;;  %v3209_v1 = vpop.f32.mrb[4].mxu1  ;;  %v319_v2 = vpop.f32.mrb[5].mxu0  ;;  %v596_v3 = vsel %vm5118_vm2, %v569_v59, %v570_v55  ;;  %v597_v4 = vsel %vm5118_vm2, %v568_v46, %v569_v59 }
  0xef   :  { %v572_v5 = vrot.slane %v3209_v1, 7  ;;  %v382_v6 = vrot.slane %v319_v2, 6  ;;  %v508_v7 = vpop.f32.mrb[5].mxu1  ;;  %v4162_v9 = vadd.f32 %v596_v3, %v407_v61  ;;  %v4164_v10 = vadd.f32 %v597_v4, %v408_v62 }
  0xf0   :  { %v571_v11 = vrot.slane %v508_v7, 7 }
  0xf1   :  { %v3174_v12 = vpop.f32.mrb[6].mxu0  ;;  %v405_v13 = vsel %vm5120_vm0, %v382_v6, %v383_v63  ;;  %v406_v14 = vsel %vm5120_vm0, %v381_v51, %v382_v6 }
  0xf2   :  { %v385_v15 = vrot.slane %v3174_v12, 6  ;;  %v3212_v8 = vpop.f32.mrb[6].mxu1  ;;  %v329_v16 = vpop.f32.mrb[7].mxu0  ;;  %v594_v17 = vsel %vm5118_vm2, %v571_v11, %v572_v5  ;;  %v595_v18 = vsel %vm5118_vm2, %v570_v55, %v571_v11 }
  0xf3   :  { %v574_v19 = vrot.slane %v3212_v8, 7  ;;  %v384_v20 = vrot.slane %v329_v16, 6  ;;  %v518_v23 = vpop.f32.mrb[7].mxu1  ;;  %v4174_v22 = vadd.f32 %v594_v17, %v405_v13  ;;  %v4176_v24 = vadd.f32 %v595_v18, %v406_v14 }
  0xf4   :  { %v573_v25 = vrot.slane %v518_v23, 7 }
  0xf5   :  { %v3177_v26 = vpop.f32.mrb[8].mxu0  ;;  %v403_v27 = vsel %vm5120_vm0, %v384_v20, %v385_v15  ;;  %v404_v28 = vsel %vm5120_vm0, %v383_v63, %v384_v20 }
  0xf6   :  { %v387_v29 = vrot.slane %v3177_v26, 6  ;;  %v3215_v30 = vpop.f32.mrb[8].mxu1  ;;  %v339_v31 = vpop.f32.mrb[9].mxu0  ;;  %v592_v32 = vsel %vm5118_vm2, %v573_v25, %v574_v19  ;;  %v593_v33 = vsel %vm5118_vm2, %v572_v5, %v573_v25 }
  0xf7   :  { %v576_v34 = vrot.slane %v3215_v30, 7  ;;  %v386_v35 = vrot.slane %v339_v31, 6  ;;  %v528_v36 = vpop.f32.mrb[9].mxu1  ;;  %v4186_v38 = vadd.f32 %v592_v32, %v403_v27  ;;  %v4188_v39 = vadd.f32 %v593_v33, %v404_v28 }
  0xf8   :  { %v575_v42 = vrot.slane %v528_v36, 7 }
  0xf9   :  { %v3180_v43 = vpop.f32.mrb[10].mxu0  ;;  %v401_v44 = vsel %vm5120_vm0, %v386_v35, %v387_v29  ;;  %v402_v46 = vsel %vm5120_vm0, %v385_v15, %v386_v35 }
  0xfa   :  { %v389_v50 = vrot.slane %v3180_v43, 6  ;;  %v3218_v0 = vpop.f32.mrb[10].mxu1  ;;  %v349_v51 = vpop.f32.mrb[11].mxu0  ;;  %v590_v52 = vsel %vm5118_vm2, %v575_v42, %v576_v34  ;;  %v591_v53 = vsel %vm5118_vm2, %v574_v19, %v575_v42 }
  0xfb   :  { %v578_v54 = vrot.slane %v3218_v0, 7  ;;  %v388_v55 = vrot.slane %v349_v51, 6  ;;  %v538_v56 = vpop.f32.mrb[11].mxu1  ;;  %v4198_v57 = vadd.f32 %v590_v52, %v401_v44  ;;  %v4200_v59 = vadd.f32 %v591_v53, %v402_v46 }
  0xfc   :  { %v577_v60 = vrot.slane %v538_v56, 7 }
  0xfd   :  { %v3183_v61 = vpop.f32.mrb[12].mxu0  ;;  %v399_v62 = vsel %vm5120_vm0, %v388_v55, %v389_v50  ;;  %v400_v63 = vsel %vm5120_vm0, %v387_v29, %v388_v55 }
  0xfe   :  { %v391_v1 = vrot.slane %v3183_v61, 6  ;;  %v3221_v2 = vpop.f32.mrb[12].mxu1  ;;  %v359_v3 = vpop.f32.mrb[13].mxu0  ;;  %v588_v4 = vsel %vm5118_vm2, %v577_v60, %v578_v54  ;;  %v589_v5 = vsel %vm5118_vm2, %v576_v34, %v577_v60 }
  0xff   :  { %v580_v6 = vrot.slane %v3221_v2, 7  ;;  %v390_v7 = vrot.slane %v359_v3, 6  ;;  %v548_v11 = vpop.f32.mrb[13].mxu1  ;;  %v4210_v12 = vadd.f32 %v588_v4, %v399_v62  ;;  %v4212_v13 = vadd.f32 %v589_v5, %v400_v63 }
 0x100   :  { %v579_v14 = vrot.slane %v548_v11, 7 }
 0x101   :  { %v3186_v15 = vpop.f32.mrb[14].mxu0  ;;  %v397_v8 = vsel %vm5120_vm0, %v390_v7, %v391_v1  ;;  %v398_v16 = vsel %vm5120_vm0, %v389_v50, %v390_v7 }
 0x102   :  { %v393_v17 = vrot.slane %v3186_v15, 6  ;;  %v3224_v18 = vpop.f32.mrb[14].mxu1  ;;  %v369_v19 = vpop.f32.mrb[15].mxu0  ;;  %v586_v20 = vsel %vm5118_vm2, %v579_v14, %v580_v6  ;;  %v587_v23 = vsel %vm5118_vm2, %v578_v54, %v579_v14 }
 0x103   :  { %v582_v25 = vrot.slane %v3224_v18, 7  ;;  %v392_v26 = vrot.slane %v369_v19, 6  ;;  %v558_v27 = vpop.f32.mrb[15].mxu1  ;;  %v4222_v28 = vadd.f32 %v586_v20, %v397_v8  ;;  %v4224_v29 = vadd.f32 %v587_v23, %v398_v16 }
 0x104   :  { %v581_v30 = vrot.slane %v558_v27, 7  ;;  %v410_v31 = vsel %vm5120_vm0, %v393_v17, %v378_v47 }
 0x105   :  { %v3241_v32 = vpop.f32.mrb[16].mxu0  ;;  %v599_v33 = vsel %vm5118_vm2, %v582_v25, %v567_v49  ;;  %v395_v34 = vsel %vm5120_vm0, %v392_v26, %v393_v17  ;;  %v396_v35 = vsel %vm5120_vm0, %v391_v1, %v392_v26 }
 0x106   :  { %v773_v36 = vadd.f32 %v3241_v32, %v4152_v58  ;;  %v3279_v42 = vpop.f32.mrb[16].mxu1  ;;  %v600_v43 = vadd.f32 %v599_v33, %v410_v31  ;;  %v693_v45 = vpop.f32.mrb[17].mxu0  ;;  %v584_v47 = vsel %vm5118_vm2, %v581_v30, %v582_v25  ;;  %v585_v48 = vsel %vm5118_vm2, %v580_v6, %v581_v30 }
 0x107   :  { %v945_v44 = vrot.slane %v3279_v42, 1  ;;  %v4243_v46 = vpop.f32.mrb[17].mxu1  ;;  %v4246_v49 = vadd.f32 %v584_v47, %v395_v34  ;;  %v4248_v50 = vadd.f32 %v585_v48, %v396_v35 }
 0x108   :  { %v772_v0 = vadd.f32 %v693_v45, %v600_v43  ;;  %v944_v58 = vrot.slane %v4243_v46, 1 }
 0x109   :  { %v3244_v51 = vpop.f32.mrb[18].mxu0 }
 0x10a   :  { %v975_v52 = vsel %vm5117_vm4, %v944_v58, %v945_v44  ;;  %v775_v53 = vadd.f32 %v3244_v51, %v4162_v9  ;;  %v3282_v54 = vpop.f32.mrb[18].mxu1  ;;  %v703_v55 = vpop.f32.mrb[19].mxu0 }
 0x10b   :  { %v4256_v56 = vadd.f32 %v975_v52, %v772_v0  ;;  %v947_v60 = vrot.slane %v3282_v54, 1  ;;  %v774_v61 = vadd.f32 %v703_v55, %v4164_v10  ;;  %v875_v62 = vpop.f32.mrb[19].mxu1 }
 0x10c   :  { %v946_v63 = vrot.slane %v875_v62, 1 }
 0x10d   :  { %v3247_v1 = vpop.f32.mrb[20].mxu0 }
 0x10e   :  { %v973_v2 = vsel %vm5117_vm4, %v946_v63, %v947_v60  ;;  %v974_v3 = vsel %vm5117_vm4, %v945_v44, %v946_v63  ;;  %v777_v4 = vadd.f32 %v3247_v1, %v4174_v22  ;;  %v3285_v5 = vpop.f32.mrb[20].mxu1  ;;  %v713_v9 = vpop.f32.mrb[21].mxu0 }
 0x10f   :  { %v4264_v6 = vadd.f32 %v974_v3, %v773_v36  ;;  %v4266_v7 = vadd.f32 %v973_v2, %v774_v61  ;;  %v949_v11 = vrot.slane %v3285_v5, 1  ;;  %v776_v10 = vadd.f32 %v713_v9, %v4176_v24  ;;  %v885_v14 = vpop.f32.mrb[21].mxu1 }
 0x110   :  { %v948_v15 = vrot.slane %v885_v14, 1  ;;  %v94_v14 = vadd.s32 8, %v4134_v41 }
 0x111   :  { %v3250_v8 = vpop.f32.mrb[22].mxu0 }
 0x112   :  { %v971_v16 = vsel %vm5117_vm4, %v948_v15, %v949_v11  ;;  %v972_v17 = vsel %vm5117_vm4, %v947_v60, %v948_v15  ;;  %v779_v22 = vadd.f32 %v3250_v8, %v4186_v38  ;;  %v3288_v18 = vpop.f32.mrb[22].mxu1  ;;  %v723_v19 = vpop.f32.mrb[23].mxu0 }
 0x113   :  { %v4274_v20 = vadd.f32 %v972_v17, %v775_v53  ;;  %v4276_v23 = vadd.f32 %v971_v16, %v776_v10  ;;  %v951_v25 = vrot.slane %v3288_v18, 1  ;;  %v778_v24 = vadd.f32 %v723_v19, %v4188_v39  ;;  %v895_v26 = vpop.f32.mrb[23].mxu1 }
 0x114   :  { %v950_v27 = vrot.slane %v895_v26, 1  ;;  %v95_v26 = vadd.s32 16, %v4134_v41 }
 0x115   :  { %v3253_v30 = vpop.f32.mrb[24].mxu0 }
 0x116   :  { %v969_v31 = vsel %vm5117_vm4, %v950_v27, %v951_v25  ;;  %v970_v32 = vsel %vm5117_vm4, %v949_v11, %v950_v27  ;;  %v781_v38 = vadd.f32 %v3253_v30, %v4198_v57  ;;  %v3291_v33 = vpop.f32.mrb[24].mxu1  ;;  %v733_v34 = vpop.f32.mrb[25].mxu0  ;;  %v109_v30 = vand.u32 15, %v4134_v41 }
 0x117   :  { %v4284_v35 = vadd.f32 %v970_v32, %v777_v4  ;;  %v4286_v36 = vadd.f32 %v969_v31, %v778_v24  ;;  %v953_v42 = vrot.slane %v3291_v33, 1  ;;  %v780_v39 = vadd.f32 %v733_v34, %v4200_v59  ;;  %v905_v43 = vpop.f32.mrb[25].mxu1 }
 0x118   :  { %v952_v45 = vrot.slane %v905_v43, 1  ;;  %v110_v31 = vand.u32 15, %v94_v14  ;;  %v96_v32 = vadd.s32 24, %v4134_v41  ;;  %v97_v43 = vadd.s32 32, %v4134_v41 }
 0x119   :  { %v3256_v47 = vpop.f32.mrb[26].mxu0  ;;  %vm4354_vm6 = vcmp.ge.s32.totalorder %v109_v30, 4 }
 0x11a   :  { %v967_v48 = vsel %vm5117_vm4, %v952_v45, %v953_v42  ;;  %v968_v44 = vsel %vm5117_vm4, %v951_v25, %v952_v45  ;;  %v783_v57 = vadd.f32 %v3256_v47, %v4210_v12  ;;  %v3294_v0 = vpop.f32.mrb[26].mxu1  ;;  %v743_v51 = vpop.f32.mrb[27].mxu0  ;;  %v111_v45 = vand.u32 15, %v95_v26 }
 0x11b   :  { %v4294_v52 = vadd.f32 %v968_v44, %v779_v22  ;;  %v4296_v53 = vadd.f32 %v967_v48, %v780_v39  ;;  %v955_v54 = vrot.slane %v3294_v0, 1  ;;  %v782_v59 = vadd.f32 %v743_v51, %v4212_v13  ;;  %v915_v55 = vpop.f32.mrb[27].mxu1  ;;  %v4350_v44 = vld [vmem:[%s5112_s2] ss:$0 sm:$0xff] }
 0x11c   :  { %v954_v60 = vrot.slane %v915_v55, 1  ;;  %v98_v47 = vadd.s32 40, %v4134_v41  ;;  %v99_v0 = vadd.s32 48, %v4134_v41  ;;  %vm4358_vm8 = vcmp.lt.s32.totalorder %v110_v31, 12 }
 0x11d   :  { %v3259_v61 = vpop.f32.mrb[28].mxu0  ;;  %vm4363_vm9 = vcmp.ge.s32.totalorder %v111_v45, 4  ;;  %v2879_v45 = vld [vmem:[%s5111_s3 + $0x78] sm:$0xff] }
 0x11e   :  { %v965_v62 = vsel %vm5117_vm4, %v954_v60, %v955_v54  ;;  %v966_v63 = vsel %vm5117_vm4, %v953_v42, %v954_v60  ;;  %v785_v12 = vadd.f32 %v3259_v61, %v4222_v28  ;;  %v3297_v1 = vpop.f32.mrb[28].mxu1  ;;  %v753_v2 = vpop.f32.mrb[29].mxu0 }
 0x11f   :  { %v4304_v3 = vadd.f32 %v966_v63, %v781_v38  ;;  %v4306_v4 = vadd.f32 %v965_v62, %v782_v59  ;;  %v957_v5 = vrot.slane %v3297_v1, 1  ;;  %v784_v13 = vadd.f32 %v753_v2, %v4224_v29  ;;  %v925_v9 = vpop.f32.mrb[29].mxu1 }
 0x120   :  { %v956_v11 = vrot.slane %v925_v9, 1  ;;  %v112_v62 = vand.u32 15, %v96_v32  ;;  %v113_v63 = vand.u32 15, %v97_v43  ;;  %v100_v2 = vadd.s32 56, %v4134_v41  ;;  %v2878_v43 = vld [vmem:[%s5111_s3 + $0x70] sm:$0xff] }
 0x121   :  { %v3262_v10 = vpop.f32.mrb[30].mxu0 }
 0x122   :  { %v963_v15 = vsel %vm5117_vm4, %v956_v11, %v957_v5  ;;  %v964_v28 = vsel %vm5117_vm4, %v955_v54, %v956_v11  ;;  %v787_v8 = vadd.f32 %v3262_v10, %v4246_v49  ;;  %v3300_v16 = vpop.f32.mrb[30].mxu1  ;;  %v763_v17 = vpop.f32.mrb[31].mxu0  ;;  %v115_v11 = vand.u32 15, %v99_v0 }
 0x123   :  { %v4315_v22 = vadd.f32 %v964_v28, %v783_v57  ;;  %v4317_v18 = vadd.f32 %v963_v15, %v784_v13  ;;  %v959_v29 = vrot.slane %v3300_v16, 1  ;;  %v786_v19 = vadd.f32 %v763_v17, %v4248_v50  ;;  %v935_v25 = vpop.f32.mrb[31].mxu1 }
 0x124   :  { %v958_v24 = vrot.slane %v935_v25, 1  ;;  %v101_v10 = vadd.s32 64, %v4134_v41  ;;  %vm4375_vm10 = vcmp.lt.s32.totalorder %v112_v62, 12  ;;  %vm4379_vm11 = vcmp.ge.s32.totalorder %v113_v63, 4 }
 0x125   :  { %v976_v49 = vsel %vm5117_vm4, %v959_v29, %v944_v58  ;;  %v3317_v27 = vpop.f32.mrb[32].mxu0  ;;  %v4384_v25 = vadd.s32 72, %v4134_v41  ;;  %v116_v26 = vand.u32 15, %v100_v2  ;;  %vm4421_vm13 = vcmp.ge.s32.totalorder %v115_v11, 4 }
 0x126   :  { %v4328_v38 = vadd.f32 %v976_v49, %v787_v8  ;;  %v961_v50 = vsel %vm5117_vm4, %v958_v24, %v959_v29  ;;  %v962_v33 = vsel %vm5117_vm4, %v957_v5, %v958_v24  ;;  %v1150_v34 = vrot.slane %v3317_v27, 2  ;;  %v4334_v42 = vpop.f32.mrb[33].mxu0  ;;  %v2858_v49 = vld [vmem:[%s5111_s3 + $0x50] sm:$0xff]  ;;  %v2859_v27 = vld [vmem:[%s5111_s3 + $0x58] sm:$0xff] }
 0x127   :  { %v4336_v46 = vadd.f32 %v962_v33, %v785_v12  ;;  %v4338_v58 = vadd.f32 %v961_v50, %v786_v19  ;;  %v1149_v39 = vrot.slane %v4334_v42, 2  ;;  %v117_v33 = vand.u32 15, %v101_v10 }
 0x128   :  { %v118_v62 = vand.u32 15, %v4384_v25  ;;  %v3601_v63 = vpack.c.bf16 %v2859_v27, %v2858_v49  ;;  %vm4444_vm14 = vcmp.lt.s32.totalorder %v116_v26, 12 }
 0x129   :  { %v1180_v48 = vsel %vm5119_vm5, %v1149_v39, %v1150_v34  ;;  %v3320_v57 = vpop.f32.mrb[34].mxu0  ;;  %vm4461_vm15 = vcmp.ge.s32.totalorder %v117_v33, 4 }
 0x12a   :  { %v1182_v51 = vadd.f32 %v1180_v48, %v4256_v56  ;;  %v1152_v54 = vrot.slane %v3320_v57, 2  ;;  %v1080_v59 = vpop.f32.mrb[35].mxu0  ;;  %v114_v56 = vand.u32 15, %v98_v47  ;;  %vm4489_vm1 = vcmp.lt.s32.totalorder %v118_v62, 12 }
 0x12b   :  { %v1151_v60 = vrot.slane %v1080_v59, 2 }
 0x12c   :  { %v1205_v12 = vadd.f32 %v4350_v44, %v1182_v51  ;;  %vm4406_vm12 = vcmp.lt.s32.totalorder %v114_v56, 12 }
 0x12d   :  { %v1178_v5 = vsel %vm5119_vm5, %v1151_v60, %v1152_v54  ;;  %v1179_v13 = vsel %vm5119_vm5, %v1150_v34, %v1151_v60  ;;  %v3323_v9 = vpop.f32.mrb[36].mxu0  ;;  %v4411_v34 = vadd.s32 80, %v4134_v41 }
 0x12e   :  { %v1183_v14 = vadd.f32 %v1179_v13, %v4264_v6  ;;  %v1184_v15 = vadd.f32 %v1178_v5, %v4266_v7  ;;  %v1154_v28 = vrot.slane %v3323_v9, 2  ;;  %v1090_v8 = vpop.f32.mrb[37].mxu0  ;;  %v1221_v16 = vmax.f32 %v1205_v12, 0.0 }
 0x12f   :  { %v1153_v17 = vrot.slane %v1090_v8, 2  ;;  %v119_v10 = vand.u32 15, %v4411_v34 }
 0x130   :  { %v1206_v24 = vadd.f32 %v4350_v44, %v1183_v14  ;;  %v1207_v6 = vadd.f32 %v4350_v44, %v1184_v15  ;;  %v4390_v7 = vsel %vm4354_vm6, %v1221_v16, 0.0  ;;  %v2896_v14 = vld [vmem:[%s5111_s3 + $0x80] sm:$0xff]  ;;  %v2897_v15 = vld [vmem:[%s5111_s3 + $0x88] sm:$0xff] }
 0x131   :  { %v1176_v30 = vsel %vm5119_vm5, %v1153_v17, %v1154_v28  ;;  %v1177_v31 = vsel %vm5119_vm5, %v1152_v54, %v1153_v17  ;;  %v3326_v32 = vpop.f32.mrb[38].mxu0  ;;  %3347 = vmatprep.mubr.msk.f32.mxu1 %vm5123_vm7, %v4390_v7  ;;  %3379 = vmatprep.mubr.msk.f32.mxu0 %vm5123_vm7, %v4390_v7  ;;  %vm4499_vm3 = vcmp.ge.s32.totalorder %v119_v10, 4 }
 0x132   :  { %v1222_v47 = vmax.f32 %v1206_v24, 0.0  ;;  %v1185_v48 = vadd.f32 %v1177_v31, %v4274_v20  ;;  %v1186_v57 = vadd.f32 %v1176_v30, %v4276_v23  ;;  %v1156_v0 = vrot.slane %v3326_v32, 2  ;;  %v1100_v51 = vpop.f32.mrb[39].mxu0 }
 0x133   :  { %v1155_v59 = vrot.slane %v1100_v51, 2  ;;  %v1223_v60 = vmax.f32 %v1207_v6, 0.0  ;;  %v3609_v23 = vpack.c.bf16 %v2879_v45, %v2878_v43  ;;  %v4475_v31 = vpack.c.bf16 %v2897_v15, %v2896_v14 }
 0x134   :  { %v1208_v12 = vadd.f32 %v4350_v44, %v1185_v48  ;;  %v1209_v56 = vadd.f32 %v4350_v44, %v1186_v57  ;;  %v4430_v20 = vsel %vm4358_vm8, %v1222_v47, 0.0 }
 0x135   :  { %v1174_v2 = vsel %vm5119_vm5, %v1155_v59, %v1156_v0  ;;  %v1175_v5 = vsel %vm5119_vm5, %v1154_v28, %v1155_v59  ;;  %v3329_v13 = vpop.f32.mrb[40].mxu0  ;;  %3348 = vmatmul.mubr.msk.f32.vlgmr.msra.gmra.mrb[32].mxu1 %vm5123_vm7, %v4430_v20  ;;  %3380 = vmatmul.mubr.msk.f32.vlgmr.msra.gmra.mrb[48].mxu0 %vm5123_vm7, %v4430_v20  ;;  %v4442_v9 = vsel %vm4363_vm9, %v1223_v60, 0.0 }
 0x136   :  { %v1187_v28 = vadd.f32 %v1175_v5, %v4284_v35  ;;  %v1188_v8 = vadd.f32 %v1174_v2, %v4286_v36  ;;  %v1158_v16 = vrot.slane %v3329_v13, 2  ;;  %v1110_v17 = vpop.f32.mrb[41].mxu0  ;;  %3350 = vmatprep.mubr.msk.f32.mxu1 %vm5123_vm7, %v4442_v9  ;;  %3382 = vmatprep.mubr.msk.f32.mxu0 %vm5123_vm7, %v4442_v9  ;;  %v1224_v25 = vmax.f32 %v1208_v12, 0.0 }
 0x137   :  { %v1157_v6 = vrot.slane %v1110_v17, 2  ;;  %3600 = vmatpush3.bf16.msra.mxu1 %v4121_v37  ;;  %v1225_v26 = vmax.f32 %v1209_v56, 0.0  ;;  %v104_v35 = vadd.s32 88, %v4134_v41  ;;  %v105_v36 = vadd.s32 96, %v4134_v41  ;;  %3608 = vmatpush3.bf16.msra.mxu0 %v4130_v40 }
 0x138   :  { %v1210_v49 = vadd.f32 %v4350_v44, %v1187_v28  ;;  %v1211_v27 = vadd.f32 %v4350_v44, %v1188_v8  ;;  %v4473_v30 = vsel %vm4375_vm10, %v1224_v25, 0.0  ;;  %3602 = vmatprep.subr.bf16.mxu1 %v3601_v63  ;;  %3610 = vmatprep.subr.bf16.mxu0 %v3609_v23  ;;  %v4523_v5 = vadd.s32 120, %v4134_v41 }
 0x139   :  { %v1172_v37 = vsel %vm5119_vm5, %v1157_v6, %v1158_v16  ;;  %v1173_v32 = vsel %vm5119_vm5, %v1156_v0, %v1157_v6  ;;  %v3332_v33 = vpop.f32.mrb[42].mxu0  ;;  %3351 = vmatmul.mubr.msk.f32.gmra.mrb[34].mxu1 %vm5123_vm7, %v4473_v30  ;;  %3383 = vmatmul.mubr.msk.f32.gmra.mrb[50].mxu0 %vm5123_vm7, %v4473_v30  ;;  %v4487_v40 = vsel %vm4379_vm11, %v1225_v26, 0.0  ;;  %v120_v60 = vand.u32 15, %v104_v35 }
 0x13a   :  { %v1189_v43 = vadd.f32 %v1173_v32, %v4294_v52  ;;  %v1190_v45 = vadd.f32 %v1172_v37, %v4296_v53  ;;  %v1160_v47 = vrot.slane %v3332_v33, 2  ;;  %v1120_v48 = vpop.f32.mrb[43].mxu0  ;;  %3353 = vmatprep.mubr.msk.f32.mxu1 %vm5123_vm7, %v4487_v40  ;;  %3385 = vmatprep.mubr.msk.f32.mxu0 %vm5123_vm7, %v4487_v40  ;;  %v1226_v57 = vmax.f32 %v1210_v49, 0.0 }
 0x13b   :  { %v1159_v0 = vrot.slane %v1120_v48, 2  ;;  %v1227_v51 = vmax.f32 %v1211_v27, 0.0  ;;  %3604 = vmatpush3.bf16.msra.mxu1 %v3601_v63  ;;  %3612 = vmatpush3.bf16.msra.mxu0 %v3609_v23  ;;  %v121_v12 = vand.u32 15, %v105_v36  ;;  %v106_v17 = vadd.s32 104, %v4134_v41 }
 0x13c   :  { %v1212_v52 = vadd.f32 %v4350_v44, %v1189_v43  ;;  %v1213_v53 = vadd.f32 %v4350_v44, %v1190_v45  ;;  %v4507_v62 = vsel %vm4406_vm12, %v1226_v57, 0.0  ;;  %3614 = vmatprep.subr.bf16.mxu1 %v4475_v31  ;;  %v107_v25 = vadd.s32 112, %v4134_v41 }
 0x13d   :  { %v1170_v56 = vsel %vm5119_vm5, %v1159_v0, %v1160_v47  ;;  %v1171_v2 = vsel %vm5119_vm5, %v1158_v16, %v1159_v0  ;;  %v3335_v63 = vpop.f32.mrb[44].mxu0  ;;  %3354 = vmatmul.mubr.msk.f32.gmra.mrb[36].mxu1 %vm5123_vm7, %v4507_v62  ;;  %3386 = vmatmul.mubr.msk.f32.gmra.mrb[52].mxu0 %vm5123_vm7, %v4507_v62  ;;  %v4520_v23 = vsel %vm4421_vm13, %v1227_v51, 0.0  ;;  %vm4539_vm4 = vcmp.lt.s32.totalorder %v120_v60, 12 }
 0x13e   :  { %v1191_v13 = vadd.f32 %v1171_v2, %v4304_v3  ;;  %v1192_v10 = vadd.f32 %v1170_v56, %v4306_v4  ;;  %v1162_v14 = vrot.slane %v3335_v63, 2  ;;  %v1130_v15 = vpop.f32.mrb[45].mxu0  ;;  %3356 = vmatprep.mubr.msk.f32.mxu1 %vm5123_vm7, %v4520_v23  ;;  %3388 = vmatprep.mubr.msk.f32.mxu0 %vm5123_vm7, %v4520_v23  ;;  %v1228_v28 = vmax.f32 %v1212_v52, 0.0 }
 0x13f   :  { %v1161_v8 = vrot.slane %v1130_v15, 2  ;;  %v1229_v16 = vmax.f32 %v1213_v53, 0.0  ;;  %v5149_v26 = vmov 0  ;;  %vm4555_vm2 = vcmp.ge.s32.totalorder %v121_v12, 4 }
 0x140   :  { %v1214_v6 = vadd.f32 %v4350_v44, %v1191_v13  ;;  %v1215_v3 = vadd.f32 %v4350_v44, %v1192_v10  ;;  %v4537_v4 = vsel %vm4444_vm14, %v1228_v28, 0.0  ;;  %v5150_v26 = vsel %vm4539_vm4, 4294967295, %v5149_v26 }
 0x141   :  { %v1168_v35 = vsel %vm5119_vm5, %v1161_v8, %v1162_v14  ;;  %v1169_v36 = vsel %vm5119_vm5, %v1160_v47, %v1161_v8  ;;  %v3338_v49 = vpop.f32.mrb[46].mxu0  ;;  %3357 = vmatmul.mubr.msk.f32.gmra.mrb[38].mxu1 %vm5123_vm7, %v4537_v4  ;;  %3389 = vmatmul.mubr.msk.f32.gmra.mrb[54].mxu0 %vm5123_vm7, %v4537_v4  ;;  %v4553_v27 = vsel %vm4461_vm15, %v1229_v16, 0.0  ;;  %v5151_v37 = vmov 0 }
 0x142   :  { %v5152_v37 = vsel %vm4555_vm2, 4294967295, %v5151_v37  ;;  %v1193_v32 = vadd.f32 %v1169_v36, %v4315_v22  ;;  %v1194_v33 = vadd.f32 %v1168_v35, %v4317_v18  ;;  %v1164_v43 = vrot.slane %v3338_v49, 2  ;;  %v1140_v45 = vpop.f32.mrb[47].mxu0  ;;  %3359 = vmatprep.mubr.msk.f32.mxu1 %vm5123_vm7, %v4553_v27  ;;  %3391 = vmatprep.mubr.msk.f32.mxu0 %vm5123_vm7, %v4553_v27  ;;  %v2898_v35 = vld [vmem:[%s5111_s3 + $0x90] sm:$0xff]  ;;  %v2899_v36 = vld [vmem:[%s5111_s3 + $0x98] sm:$0xff] }
 0x143   :  { %v1230_v47 = vmax.f32 %v1214_v6, 0.0  ;;  %v1163_v48 = vrot.slane %v1140_v45, 2  ;;  %v1231_v57 = vmax.f32 %v1215_v3, 0.0  ;;  %v122_v0 = vand.u32 15, %v106_v17 }
 0x144   :  { %v123_v51 = vand.u32 15, %v107_v25  ;;  %v1216_v60 = vadd.f32 %v4350_v44, %v1193_v32  ;;  %v1217_v52 = vadd.f32 %v4350_v44, %v1194_v33  ;;  %v1181_v22 = vsel %vm5119_vm5, %v1164_v43, %v1149_v39 }
 0x145   :  { %v4573_v18 = vsel %vm4489_vm1, %v1230_v47, 0.0  ;;  %v1197_v53 = vadd.f32 %v1181_v22, %v4328_v38  ;;  %v1166_v12 = vsel %vm5119_vm5, %v1163_v48, %v1164_v43  ;;  %v1167_v56 = vsel %vm5119_vm5, %v1162_v14, %v1163_v48 }
 0x146   :  { %3360 = vmatmul.mubr.msk.f32.gmra.mrb[40].mxu1 %vm5123_vm7, %v4573_v18  ;;  %3392 = vmatmul.mubr.msk.f32.gmra.mrb[56].mxu0 %vm5123_vm7, %v4573_v18  ;;  %v4586_v42 = vsel %vm4499_vm3, %v1231_v57, 0.0  ;;  %v1195_v39 = vadd.f32 %v1167_v56, %v4336_v46  ;;  %v1196_v38 = vadd.f32 %v1166_v12, %v4338_v58  ;;  %v1232_v2 = vmax.f32 %v1216_v60, 0.0 }
 0x147   :  { %3362 = vmatprep.mubr.msk.f32.mxu1 %vm5123_vm7, %v4586_v42  ;;  %3394 = vmatprep.mubr.msk.f32.mxu0 %vm5123_vm7, %v4586_v42  ;;  %v1233_v63 = vmax.f32 %v1217_v52, 0.0  ;;  %v1220_v13 = vadd.f32 %v4350_v44, %v1197_v53  ;;  %vm4609_vm5 = vcmp.lt.s32.totalorder %v122_v0, 12  ;;  %v5153_v58 = vmov 0 }
 0x148   :  { %v1218_v10 = vadd.f32 %v4350_v44, %v1195_v39  ;;  %v1219_v14 = vadd.f32 %v4350_v44, %v1196_v38  ;;  %v4599_v15 = vsel %vm4539_vm4, %v1232_v2, 0.0  ;;  %v5154_v58 = vsel %vm4609_vm5, 4294967295, %v5153_v58 }
 0x149   :  { %v4603_v46 = vsel %vm4555_vm2, %v1233_v63, 0.0  ;;  %vm4613_vm0 = vcmp.ge.s32.totalorder %v123_v51, 4  ;;  %v5155_v44 = vmov 0  ;;  %v124_v28 = vand.u32 15, %v4523_v5 }
 0x14a   :  { %3363 = vmatmul.mubr.msk.f32.gmra.mrb[42].mxu1 %vm5123_vm7, %v4599_v15  ;;  %3395 = vmatmul.mubr.msk.f32.gmra.mrb[58].mxu0 %vm5123_vm7, %v4599_v15  ;;  %v5156_v44 = vsel %vm4613_vm0, 4294967295, %v5155_v44  ;;  %v1234_v8 = vmax.f32 %v1218_v10, 0.0  ;;  %v1235_v16 = vmax.f32 %v1219_v14, 0.0  ;;  %v1236_v6 = vmax.f32 %v1220_v13, 0.0 }
 0x14b   :  { %3365 = vmatprep.mubr.msk.f32.mxu1 %vm5123_vm7, %v4603_v46  ;;  %3397 = vmatprep.mubr.msk.f32.mxu0 %vm5123_vm7, %v4603_v46  ;;  %vm4628_vm2 = vcmp.lt.s32.totalorder %v124_v28, 12  ;;  %v5157_v5 = vmov 0  ;;  %v3617_v49 = vpack.c.bf16 %v2899_v36, %v2898_v35 }
 0x14c   :  { %v1250_v17 = vsel %vm4609_vm5, %v1234_v8, 0.0  ;;  %v1251_v25 = vsel %vm4613_vm0, %v1235_v16, 0.0  ;;  %v5158_v5 = vsel %vm4628_vm2, 4294967295, %v5157_v5  ;;  %v1252_v3 = vsel %vm4628_vm2, %v1236_v6, 0.0 }
 0x14d   :  { %vm5159_vm0 = vcmp.lt.s32.totalorder %v4134_v41, 2 }
 0x14e   :  { %3366 = vmatmul.mubr.msk.f32.gmra.mrb[44].mxu1 %vm5123_vm7, %v1250_v17  ;;  %3398 = vmatmul.mubr.msk.f32.gmra.mrb[60].mxu0 %vm5123_vm7, %v1250_v17  ;;  %vm5161_vm5 = vmmov %vm5159_vm0 }
 0x14f   :  { %3368 = vmatprep.mubr.msk.f32.mxu1 %vm5123_vm7, %v1251_v25  ;;  %3400 = vmatprep.mubr.msk.f32.mxu0 %vm5123_vm7, %v1251_v25  ;;  %vm5163_vm2 = vmmov %vm5161_vm5 }
 0x152   :  { %3369 = vmatmul.mubr.msk.f32.gmra.mrb[46].mxu1 %vm5123_vm7, %v1252_v3  ;;  %3401 = vmatmul.mubr.msk.f32.gmra.mrb[62].mxu0 %vm5123_vm7, %v1252_v3 }
 0x153   :  { %3411 = vmatprep.mubr.msk.f32.mxu1 %vm5123_vm7, %v4390_v7  ;;  %3443 = vmatprep.mubr.msk.f32.mxu0 %vm5123_vm7, %v4390_v7 }
 0x156   :  { %3412 = vmatmul.mubr.msk.f32.vlgmr.msra.gmra.mrb[48].mxu1 %vm5123_vm7, %v4430_v20  ;;  %3444 = vmatmul.mubr.msk.f32.vlgmr.msra.gmra.mrb[64].mxu0 %vm5123_vm7, %v4430_v20 }
 0x157   :  { %3414 = vmatprep.mubr.msk.f32.mxu1 %vm5123_vm7, %v4442_v9  ;;  %3446 = vmatprep.mubr.msk.f32.mxu0 %vm5123_vm7, %v4442_v9 }
 0x158   :  { %3616 = vmatpush3.bf16.msra.mxu1 %v4475_v31 }
 0x159   :  { %3618 = vmatprep.subr.bf16.mxu1 %v3617_v49 }
 0x15a   :  { %3415 = vmatmul.mubr.msk.f32.gmra.mrb[50].mxu1 %vm5123_vm7, %v4473_v30  ;;  %3447 = vmatmul.mubr.msk.f32.gmra.mrb[66].mxu0 %vm5123_vm7, %v4473_v30 }
 0x15b   :  { %3417 = vmatprep.mubr.msk.f32.mxu1 %vm5123_vm7, %v4487_v40  ;;  %3449 = vmatprep.mubr.msk.f32.mxu0 %vm5123_vm7, %v4487_v40 }
 0x15c   :  { %3620 = vmatpush3.bf16.msra.mxu1 %v3617_v49 }
 0x15e   :  { %3418 = vmatmul.mubr.msk.f32.gmra.mrb[52].mxu1 %vm5123_vm7, %v4507_v62  ;;  %3450 = vmatmul.mubr.msk.f32.gmra.mrb[68].mxu0 %vm5123_vm7, %v4507_v62 }
 0x15f   :  { %3420 = vmatprep.mubr.msk.f32.mxu1 %vm5123_vm7, %v4520_v23  ;;  %3452 = vmatprep.mubr.msk.f32.mxu0 %vm5123_vm7, %v4520_v23 }
 0x162   :  { %3421 = vmatmul.mubr.msk.f32.gmra.mrb[54].mxu1 %vm5123_vm7, %v4537_v4  ;;  %3453 = vmatmul.mubr.msk.f32.gmra.mrb[70].mxu0 %vm5123_vm7, %v4537_v4 }
 0x163   :  { %3423 = vmatprep.mubr.msk.f32.mxu1 %vm5123_vm7, %v4553_v27  ;;  %3455 = vmatprep.mubr.msk.f32.mxu0 %vm5123_vm7, %v4553_v27 }
 0x166   :  { %3424 = vmatmul.mubr.msk.f32.gmra.mrb[56].mxu1 %vm5123_vm7, %v4573_v18  ;;  %3456 = vmatmul.mubr.msk.f32.gmra.mrb[72].mxu0 %vm5123_vm7, %v4573_v18 }
 0x167   :  { %3426 = vmatprep.mubr.msk.f32.mxu1 %vm5123_vm7, %v4586_v42  ;;  %3458 = vmatprep.mubr.msk.f32.mxu0 %vm5123_vm7, %v4586_v42 }
 0x16a   :  { %3427 = vmatmul.mubr.msk.f32.gmra.mrb[58].mxu1 %vm5123_vm7, %v4599_v15  ;;  %3459 = vmatmul.mubr.msk.f32.gmra.mrb[74].mxu0 %vm5123_vm7, %v4599_v15 }
 0x16b   :  { %3429 = vmatprep.mubr.msk.f32.mxu1 %vm5123_vm7, %v4603_v46  ;;  %3461 = vmatprep.mubr.msk.f32.mxu0 %vm5123_vm7, %v4603_v46 }
 0x16e   :  { %3430 = vmatmul.mubr.msk.f32.gmra.mrb[60].mxu1 %vm5123_vm7, %v1250_v17  ;;  %3462 = vmatmul.mubr.msk.f32.gmra.mrb[76].mxu0 %vm5123_vm7, %v1250_v17 }
 0x16f   :  { %3432 = vmatprep.mubr.msk.f32.mxu1 %vm5123_vm7, %v1251_v25  ;;  %3464 = vmatprep.mubr.msk.f32.mxu0 %vm5123_vm7, %v1251_v25 }
 0x172   :  { %3433 = vmatmul.mubr.msk.f32.gmra.mrb[62].mxu1 %vm5123_vm7, %v1252_v3  ;;  %3465 = vmatmul.mubr.msk.f32.gmra.mrb[78].mxu0 %vm5123_vm7, %v1252_v3 }
 0x173   :  { %3475 = vmatprep.mubr.msk.f32.mxu1 %vm5123_vm7, %v4390_v7 }
 0x176   :  { %3476 = vmatmul.mubr.msk.f32.vlgmr.msra.gmra.mrb[64].mxu1 %vm5123_vm7, %v4430_v20 }
 0x177   :  { %3478 = vmatprep.mubr.msk.f32.mxu1 %vm5123_vm7, %v4442_v9 }
 0x17a   :  { %3479 = vmatmul.mubr.msk.f32.gmra.mrb[66].mxu1 %vm5123_vm7, %v4473_v30 }
 0x17b   :  { %3481 = vmatprep.mubr.msk.f32.mxu1 %vm5123_vm7, %v4487_v40 }
 0x17e   :  { %3482 = vmatmul.mubr.msk.f32.gmra.mrb[68].mxu1 %vm5123_vm7, %v4507_v62 }
 0x17f   :  { %3484 = vmatprep.mubr.msk.f32.mxu1 %vm5123_vm7, %v4520_v23 }
 0x182   :  { %3485 = vmatmul.mubr.msk.f32.gmra.mrb[70].mxu1 %vm5123_vm7, %v4537_v4 }
 0x183   :  { %3487 = vmatprep.mubr.msk.f32.mxu1 %vm5123_vm7, %v4553_v27 }
 0x186   :  { %3488 = vmatmul.mubr.msk.f32.gmra.mrb[72].mxu1 %vm5123_vm7, %v4573_v18 }
 0x187   :  { %3490 = vmatprep.mubr.msk.f32.mxu1 %vm5123_vm7, %v4586_v42 }
 0x18a   :  { %3491 = vmatmul.mubr.msk.f32.gmra.mrb[74].mxu1 %vm5123_vm7, %v4599_v15 }
 0x18b   :  { %3493 = vmatprep.mubr.msk.f32.mxu1 %vm5123_vm7, %v4603_v46 }
 0x18e   :  { %3494 = vmatmul.mubr.msk.f32.gmra.mrb[76].mxu1 %vm5123_vm7, %v1250_v17 }
 0x18f   :  { %3496 = vmatprep.mubr.msk.f32.mxu1 %vm5123_vm7, %v1251_v25 }
 0x192   :  { %3497 = vmatmul.mubr.msk.f32.gmra.mrb[78].mxu1 %vm5123_vm7, %v1252_v3  ;;  %vm5160_vm7 = vcmp.lt.s32.totalorder %v4134_v41, 1 }
 0x208   :  { %v3349_v7 = vpop.f32.mrb[32].mxu1  ;;  %v3381_v20 = vpop.f32.mrb[48].mxu0 }
 0x209   :  { %v1452_v9 = vrot.slane %v3349_v7, 6  ;;  %v1634_v30 = vrot.slane %v3381_v20, 7  ;;  %v4732_v31 = vpop.f32.mrb[33].mxu1  ;;  %v4734_v40 = vpop.f32.mrb[49].mxu0 }
 0x20a   :  { %v1451_v62 = vrot.slane %v4732_v31, 6  ;;  %v1633_v23 = vrot.slane %v4734_v40, 7 }
 0x20c   :  { %v3352_v4 = vpop.f32.mrb[34].mxu1  ;;  %v3384_v27 = vpop.f32.mrb[50].mxu0  ;;  %v1481_v32 = vsel %vm5159_vm0, %v1451_v62, %v1452_v9  ;;  %v1663_v33 = vsel %vm5160_vm7, %v1633_v23, %v1634_v30  ;;  %vm5162_vm0 = vmmov %vm5160_vm7 }
 0x20d   :  { %v1454_v43 = vrot.slane %v3352_v4, 6  ;;  %v1636_v45 = vrot.slane %v3384_v27, 7  ;;  %v1382_v47 = vpop.f32.mrb[35].mxu1  ;;  %v1564_v48 = vpop.f32.mrb[51].mxu0  ;;  %v4746_v57 = vadd.f32 %v1663_v33, %v1481_v32  ;;  %vm5164_vm7 = vmmov %vm5162_vm0 }
 0x20e   :  { %v1453_v0 = vrot.slane %v1382_v47, 6  ;;  %v1635_v51 = vrot.slane %v1564_v48, 7 }
 0x210   :  { %v3355_v60 = vpop.f32.mrb[36].mxu1  ;;  %v3387_v52 = vpop.f32.mrb[52].mxu0  ;;  %v1479_v22 = vsel %vm5161_vm5, %v1453_v0, %v1454_v43  ;;  %v1661_v18 = vsel %vm5162_vm0, %v1635_v51, %v1636_v45  ;;  %v1480_v53 = vsel %vm5163_vm2, %v1452_v9, %v1453_v0  ;;  %v1662_v12 = vsel %vm5164_vm7, %v1634_v30, %v1635_v51  ;;  %vm5165_vm5 = vmmov %vm5163_vm2 }
 0x211   :  { %v1456_v56 = vrot.slane %v3355_v60, 6  ;;  %v1638_v42 = vrot.slane %v3387_v52, 7  ;;  %v1392_v39 = vpop.f32.mrb[37].mxu1  ;;  %v1574_v38 = vpop.f32.mrb[53].mxu0  ;;  %v4756_v2 = vadd.f32 %v1661_v18, %v1479_v22  ;;  %v4758_v63 = vadd.f32 %v1662_v12, %v1480_v53  ;;  %vm5166_vm2 = vmmov %vm5162_vm0 }
 0x212   :  { %v1455_v13 = vrot.slane %v1392_v39, 6  ;;  %v1637_v10 = vrot.slane %v1574_v38, 7  ;;  %vm5167_vm0 = vmmov %vm5165_vm5 }
 0x213   :  { %vm5168_vm7 = vmmov %vm5166_vm2 }
 0x214   :  { %v3358_v14 = vpop.f32.mrb[38].mxu1  ;;  %v3390_v15 = vpop.f32.mrb[54].mxu0  ;;  %v1477_v46 = vsel %vm5165_vm5, %v1455_v13, %v1456_v56  ;;  %v1659_v28 = vsel %vm5166_vm2, %v1637_v10, %v1638_v42  ;;  %v1478_v8 = vsel %vm5167_vm0, %v1454_v43, %v1455_v13  ;;  %v1660_v16 = vsel %vm5168_vm7, %v1636_v45, %v1637_v10  ;;  %vm5169_vm5 = vmmov %vm5167_vm0 }
 0x215   :  { %v1458_v17 = vrot.slane %v3358_v14, 6  ;;  %v1640_v25 = vrot.slane %v3390_v15, 7  ;;  %v1402_v6 = vpop.f32.mrb[39].mxu1  ;;  %v1584_v3 = vpop.f32.mrb[55].mxu0  ;;  %v4768_v35 = vadd.f32 %v1659_v28, %v1477_v46  ;;  %v4770_v36 = vadd.f32 %v1660_v16, %v1478_v8  ;;  %vm5170_vm7 = vmmov %vm5166_vm2 }
 0x216   :  { %v1457_v49 = vrot.slane %v1402_v6, 6  ;;  %v1639_v7 = vrot.slane %v1584_v3, 7  ;;  %vm5179_vm4 = vmmov %vm5167_vm0 }
 0x218   :  { %v1475_v30 = vsel %vm5169_vm5, %v1457_v49, %v1458_v17  ;;  %v1657_v4 = vsel %vm5166_vm2, %v1639_v7, %v1640_v25  ;;  %v1476_v27 = vsel %vm5167_vm0, %v1456_v56, %v1457_v49  ;;  %v1658_v32 = vsel %vm5170_vm7, %v1638_v42, %v1639_v7  ;;  %vm5171_vm5 = vmmov %vm5167_vm0 }
 0x219   :  { %v3361_v20 = vpop.f32.mrb[40].mxu1  ;;  %v3393_v9 = vpop.f32.mrb[56].mxu0  ;;  %v4780_v48 = vadd.f32 %v1657_v4, %v1475_v30  ;;  %v4782_v0 = vadd.f32 %v1658_v32, %v1476_v27  ;;  %vm5172_vm7 = vmmov %vm5166_vm2 }
 0x21a   :  { %v1460_v33 = vrot.slane %v3361_v20, 6  ;;  %v1642_v43 = vrot.slane %v3393_v9, 7  ;;  %v1412_v45 = vpop.f32.mrb[41].mxu1  ;;  %v1594_v47 = vpop.f32.mrb[57].mxu0 }
 0x21b   :  { %v1459_v51 = vrot.slane %v1412_v45, 6  ;;  %v1641_v60 = vrot.slane %v1594_v47, 7 }
 0x21d   :  { %v3364_v52 = vpop.f32.mrb[42].mxu1  ;;  %v3396_v22 = vpop.f32.mrb[58].mxu0  ;;  %v1473_v18 = vsel %vm5171_vm5, %v1459_v51, %v1460_v33  ;;  %v1655_v53 = vsel %vm5166_vm2, %v1641_v60, %v1642_v43  ;;  %v1474_v12 = vsel %vm5167_vm0, %v1458_v17, %v1459_v51  ;;  %v1656_v56 = vsel %vm5172_vm7, %v1640_v25, %v1641_v60  ;;  %vm5173_vm5 = vmmov %vm5167_vm0 }
 0x21e   :  { %v1462_v42 = vrot.slane %v3364_v52, 6  ;;  %v1644_v39 = vrot.slane %v3396_v22, 7  ;;  %v1422_v38 = vpop.f32.mrb[43].mxu1  ;;  %v1604_v13 = vpop.f32.mrb[59].mxu0  ;;  %v4792_v10 = vadd.f32 %v1655_v53, %v1473_v18  ;;  %v4794_v14 = vadd.f32 %v1656_v56, %v1474_v12  ;;  %vm5174_vm7 = vmmov %vm5166_vm2 }
 0x21f   :  { %v1461_v15 = vrot.slane %v1422_v38, 6  ;;  %v1643_v46 = vrot.slane %v1604_v13, 7 }
 0x221   :  { %v3367_v28 = vpop.f32.mrb[44].mxu1  ;;  %v3399_v8 = vpop.f32.mrb[60].mxu0  ;;  %v1471_v16 = vsel %vm5173_vm5, %v1461_v15, %v1462_v42  ;;  %v1653_v17 = vsel %vm5166_vm2, %v1643_v46, %v1644_v39  ;;  %v1472_v25 = vsel %vm5167_vm0, %v1460_v33, %v1461_v15  ;;  %v1654_v6 = vsel %vm5174_vm7, %v1642_v43, %v1643_v46  ;;  %vm5175_vm5 = vmmov %vm5167_vm0 }
 0x222   :  { %v1464_v3 = vrot.slane %v3367_v28, 6  ;;  %v1646_v49 = vrot.slane %v3399_v8, 7  ;;  %v1432_v7 = vpop.f32.mrb[45].mxu1  ;;  %v1614_v20 = vpop.f32.mrb[61].mxu0  ;;  %v4804_v9 = vadd.f32 %v1653_v17, %v1471_v16  ;;  %v4806_v30 = vadd.f32 %v1654_v6, %v1472_v25  ;;  %vm5176_vm7 = vmmov %vm5166_vm2 }
 0x223   :  { %v1463_v4 = vrot.slane %v1432_v7, 6  ;;  %v1645_v27 = vrot.slane %v1614_v20, 7 }
 0x225   :  { %v3370_v32 = vpop.f32.mrb[46].mxu1  ;;  %v3402_v45 = vpop.f32.mrb[62].mxu0  ;;  %v1469_v47 = vsel %vm5175_vm5, %v1463_v4, %v1464_v3  ;;  %v1651_v33 = vsel %vm5166_vm2, %v1645_v27, %v1646_v49  ;;  %v1470_v43 = vsel %vm5167_vm0, %v1462_v42, %v1463_v4  ;;  %v1652_v51 = vsel %vm5176_vm7, %v1644_v39, %v1645_v27  ;;  %vm5177_vm5 = vmmov %vm5167_vm0 }
 0x226   :  { %v1466_v60 = vrot.slane %v3370_v32, 6  ;;  %v1648_v52 = vrot.slane %v3402_v45, 7  ;;  %v1442_v22 = vpop.f32.mrb[47].mxu1  ;;  %v1624_v18 = vpop.f32.mrb[63].mxu0  ;;  %v4816_v53 = vadd.f32 %v1651_v33, %v1469_v47  ;;  %v4818_v12 = vadd.f32 %v1652_v51, %v1470_v43  ;;  %vm5178_vm7 = vmmov %vm5166_vm2 }
 0x227   :  { %v1465_v56 = vrot.slane %v1442_v22, 6  ;;  %v1647_v38 = vrot.slane %v1624_v18, 7 }
 0x228   :  { %v1482_v13 = vsel %vm5177_vm5, %v1466_v60, %v1451_v62  ;;  %v1664_v42 = vsel %vm5166_vm2, %v1648_v52, %v1633_v23  ;;  %vm5180_vm5 = vmmov %vm5166_vm2 }
 0x229   :  { %v3413_v39 = vpop.f32.mrb[48].mxu1  ;;  %v3445_v15 = vpop.f32.mrb[64].mxu0  ;;  %v1665_v46 = vadd.f32 %v1664_v42, %v1482_v13  ;;  %v1467_v28 = vsel %vm5167_vm0, %v1465_v56, %v1466_v60  ;;  %v1649_v8 = vsel %vm5178_vm7, %v1647_v38, %v1648_v52  ;;  %v1468_v31 = vsel %vm5179_vm4, %v1464_v3, %v1465_v56 }
 0x22a   :  { %v1832_v16 = vadd.f32 %v3413_v39, %v4746_v57  ;;  %v1998_v62 = vrot.slane %v3445_v15, 1  ;;  %v1752_v17 = vpop.f32.mrb[49].mxu1  ;;  %v4835_v40 = vpop.f32.mrb[65].mxu0  ;;  %v4837_v25 = vadd.f32 %v1649_v8, %v1467_v28  ;;  %v1650_v23 = vsel %vm5180_vm5, %v1646_v49, %v1647_v38 }
 0x22b   :  { %v1831_v6 = vadd.f32 %v1752_v17, %v1665_v46  ;;  %v1997_v7 = vrot.slane %v4835_v40, 1  ;;  %v4842_v20 = vadd.f32 %v1650_v23, %v1468_v31  ;;  %vm5181_vm4 = vcmp.lt.s32.totalorder %v4134_v41, 7 }
 0x22c   :  { %vm5182_vm2 = vmmov %vm5181_vm4 }
 0x22d   :  { %v2027_v3 = vsel %vm5181_vm4, %v1997_v7, %v1998_v62  ;;  %v3416_v57 = vpop.f32.mrb[50].mxu1  ;;  %v3448_v4 = vpop.f32.mrb[66].mxu0  ;;  %vm5183_vm0 = vmmov %vm5182_vm2 }
 0x22e   :  { %v4848_v27 = vadd.f32 %v2027_v3, %v1831_v6  ;;  %v1834_v32 = vadd.f32 %v3416_v57, %v4756_v2  ;;  %v2000_v45 = vrot.slane %v3448_v4, 1  ;;  %v1762_v47 = vpop.f32.mrb[51].mxu1  ;;  %v1928_v33 = vpop.f32.mrb[67].mxu0  ;;  %vm5184_vm7 = vmmov %vm5183_vm0 }
 0x22f   :  { %v1833_v49 = vadd.f32 %v1762_v47, %v4758_v63  ;;  %v1999_v43 = vrot.slane %v1928_v33, 1  ;;  %vm5185_vm5 = vmmov %vm5183_vm0 }
 0x230   :  { %vm5186_vm4 = vmmov %vm5183_vm0 }
 0x231   :  { %v2025_v51 = vsel %vm5182_vm2, %v1999_v43, %v2000_v45  ;;  %v2026_v60 = vsel %vm5183_vm0, %v1998_v62, %v1999_v43  ;;  %v3419_v52 = vpop.f32.mrb[52].mxu1  ;;  %v3451_v22 = vpop.f32.mrb[68].mxu0  ;;  %vm5187_vm2 = vmmov %vm5183_vm0 }
 0x232   :  { %v4856_v18 = vadd.f32 %v2026_v60, %v1832_v16  ;;  %v4858_v56 = vadd.f32 %v2025_v51, %v1833_v49  ;;  %v1836_v2 = vadd.f32 %v3419_v52, %v4768_v35  ;;  %v2002_v38 = vrot.slane %v3451_v22, 1  ;;  %v1772_v13 = vpop.f32.mrb[53].mxu1  ;;  %v1938_v42 = vpop.f32.mrb[69].mxu0 }
 0x233   :  { %v1835_v63 = vadd.f32 %v1772_v13, %v4770_v36  ;;  %v2001_v39 = vrot.slane %v1938_v42, 1 }
 0x235   :  { %v2023_v15 = vsel %vm5184_vm7, %v2001_v39, %v2002_v38  ;;  %v2024_v46 = vsel %vm5185_vm5, %v2000_v45, %v2001_v39  ;;  %v3422_v28 = vpop.f32.mrb[54].mxu1  ;;  %v3454_v8 = vpop.f32.mrb[70].mxu0  ;;  %vm5188_vm7 = vmmov %vm5183_vm0 }
 0x236   :  { %v4866_v31 = vadd.f32 %v2024_v46, %v1834_v32  ;;  %v4868_v16 = vadd.f32 %v2023_v15, %v1835_v63  ;;  %v1838_v35 = vadd.f32 %v3422_v28, %v4780_v48  ;;  %v2004_v62 = vrot.slane %v3454_v8, 1  ;;  %v1782_v17 = vpop.f32.mrb[55].mxu1  ;;  %v1948_v23 = vpop.f32.mrb[71].mxu0  ;;  %vm5189_vm5 = vmmov %vm5183_vm0 }
 0x237   :  { %v1837_v36 = vadd.f32 %v1782_v17, %v4782_v0  ;;  %v2003_v6 = vrot.slane %v1948_v23, 1 }
 0x239   :  { %v2021_v3 = vsel %vm5186_vm4, %v2003_v6, %v2004_v62  ;;  %v2022_v57 = vsel %vm5187_vm2, %v2002_v38, %v2003_v6  ;;  %v3425_v4 = vpop.f32.mrb[56].mxu1  ;;  %v3457_v45 = vpop.f32.mrb[72].mxu0  ;;  %vm5190_vm4 = vmmov %vm5183_vm0 }
 0x23a   :  { %v4876_v32 = vadd.f32 %v2022_v57, %v1836_v2  ;;  %v4878_v47 = vadd.f32 %v2021_v3, %v1837_v36  ;;  %v1840_v48 = vadd.f32 %v3425_v4, %v4792_v10  ;;  %v2006_v33 = vrot.slane %v3457_v45, 1  ;;  %v1792_v49 = vpop.f32.mrb[57].mxu1  ;;  %v1958_v43 = vpop.f32.mrb[73].mxu0  ;;  %vm5191_vm2 = vmmov %vm5183_vm0 }
 0x23b   :  { %v1839_v0 = vadd.f32 %v1792_v49, %v4794_v14  ;;  %v2005_v51 = vrot.slane %v1958_v43, 1 }
 0x23d   :  { %v2019_v60 = vsel %vm5183_vm0, %v2005_v51, %v2006_v33  ;;  %v2020_v52 = vsel %vm5188_vm7, %v2004_v62, %v2005_v51  ;;  %v3428_v22 = vpop.f32.mrb[58].mxu1  ;;  %v3460_v38 = vpop.f32.mrb[74].mxu0  ;;  %vm5192_vm7 = vmmov %vm5183_vm0 }
 0x23e   :  { %v4886_v2 = vadd.f32 %v2020_v52, %v1838_v35  ;;  %v4888_v13 = vadd.f32 %v2019_v60, %v1839_v0  ;;  %v1842_v10 = vadd.f32 %v3428_v22, %v4804_v9  ;;  %v2008_v42 = vrot.slane %v3460_v38, 1  ;;  %v1802_v63 = vpop.f32.mrb[59].mxu1  ;;  %v1968_v39 = vpop.f32.mrb[75].mxu0 }
 0x23f   :  { %v1841_v14 = vadd.f32 %v1802_v63, %v4806_v30  ;;  %v2007_v15 = vrot.slane %v1968_v39, 1 }
 0x241   :  { %v2017_v46 = vsel %vm5189_vm5, %v2007_v15, %v2008_v42  ;;  %v2018_v28 = vsel %vm5190_vm4, %v2006_v33, %v2007_v15  ;;  %v3431_v8 = vpop.f32.mrb[60].mxu1  ;;  %v3463_v62 = vpop.f32.mrb[76].mxu0  ;;  %vm5193_vm5 = vmmov %vm5183_vm0 }
 0x242   :  { %v4896_v35 = vadd.f32 %v2018_v28, %v1840_v48  ;;  %v4898_v17 = vadd.f32 %v2017_v46, %v1841_v14  ;;  %v1844_v9 = vadd.f32 %v3431_v8, %v4816_v53  ;;  %v2010_v23 = vrot.slane %v3463_v62, 1  ;;  %v1812_v36 = vpop.f32.mrb[61].mxu1  ;;  %v1978_v6 = vpop.f32.mrb[77].mxu0  ;;  %vm5194_vm4 = vmmov %vm5183_vm0  ;;  %v4936_v14 = vld [vmem:[%s5113_s4] ss:$0 sm:$0xff] }
 0x243   :  { %v1843_v30 = vadd.f32 %v1812_v36, %v4818_v12  ;;  %v2009_v3 = vrot.slane %v1978_v6, 1 }
 0x245   :  { %v2015_v57 = vsel %vm5191_vm2, %v2009_v3, %v2010_v23  ;;  %v2016_v4 = vsel %vm5183_vm0, %v2008_v42, %v2009_v3  ;;  %v3434_v45 = vpop.f32.mrb[62].mxu1  ;;  %v3466_v33 = vpop.f32.mrb[78].mxu0  ;;  %vm5195_vm2 = vcmp.lt.s32.totalorder %v4134_v41, 6 }
 0x246   :  { %v4906_v48 = vadd.f32 %v2016_v4, %v1842_v10  ;;  %v4908_v49 = vadd.f32 %v2015_v57, %v1843_v30  ;;  %v1846_v53 = vadd.f32 %v3434_v45, %v4837_v25  ;;  %v2012_v43 = vrot.slane %v3466_v33, 1  ;;  %v1822_v0 = vpop.f32.mrb[63].mxu1  ;;  %v1988_v51 = vpop.f32.mrb[79].mxu0  ;;  %vm5196_vm0 = vmmov %vm5195_vm2 }
 0x247   :  { %v1845_v12 = vadd.f32 %v1822_v0, %v4842_v20  ;;  %v2011_v60 = vrot.slane %v1988_v51, 1 }
 0x248   :  { %v2028_v52 = vsel %vm5192_vm7, %v2012_v43, %v1997_v7  ;;  %vm5197_vm7 = vmmov %vm5196_vm0 }
 0x249   :  { %v4916_v22 = vadd.f32 %v2028_v52, %v1846_v53  ;;  %v2013_v38 = vsel %vm5193_vm5, %v2011_v60, %v2012_v43  ;;  %v2014_v10 = vsel %vm5194_vm4, %v2010_v23, %v2011_v60  ;;  %v3477_v25 = vpop.f32.mrb[64].mxu1  ;;  %vm5198_vm5 = vmmov %vm5196_vm0 }
 0x24a   :  { %v4922_v42 = vadd.f32 %v2014_v10, %v1844_v9  ;;  %v4924_v63 = vadd.f32 %v2013_v38, %v1845_v12  ;;  %v2196_v20 = vrot.slane %v3477_v25, 2  ;;  %v4926_v39 = vpop.f32.mrb[65].mxu1  ;;  %vm5199_vm4 = vmmov %vm5196_vm0 }
 0x24b   :  { %v2195_v40 = vrot.slane %v4926_v39, 2 }
 0x24d   :  { %v2225_v7 = vsel %vm5195_vm2, %v2195_v40, %v2196_v20  ;;  %v3480_v15 = vpop.f32.mrb[66].mxu1  ;;  %vm5200_vm2 = vcmask 261120  }
 0x24e   :  { %v2227_v46 = vadd.f32 %v2225_v7, %v4848_v27  ;;  %v2198_v28 = vrot.slane %v3480_v15, 2  ;;  %v2126_v8 = vpop.f32.mrb[67].mxu1 }
 0x24f   :  { %v2197_v62 = vrot.slane %v2126_v8, 2 }
 0x250   :  { %v2250_v9 = vadd.f32 %v4936_v14, %v2227_v46 }
 0x251   :  { %v2223_v23 = vsel %vm5196_vm0, %v2197_v62, %v2198_v28  ;;  %v2224_v36 = vsel %vm5197_vm7, %v2196_v20, %v2197_v62  ;;  %v3483_v6 = vpop.f32.mrb[68].mxu1  ;;  %vm5202_vm7 = vmmov %vm5196_vm0 }
 0x252   :  { %v2266_v30 = vmax.f32 %v2250_v9, 0.0  ;;  %v2228_v3 = vadd.f32 %v2224_v36, %v4856_v18  ;;  %v2229_v57 = vadd.f32 %v2223_v23, %v4858_v56  ;;  %v2200_v4 = vrot.slane %v3483_v6, 2  ;;  %v2136_v45 = vpop.f32.mrb[69].mxu1 }
 0x253   :  { %v2199_v27 = vrot.slane %v2136_v45, 2 }
 0x254   :  { %v2251_v33 = vadd.f32 %v4936_v14, %v2228_v3  ;;  %v2252_v53 = vadd.f32 %v4936_v14, %v2229_v57  ;;  %v2282_v43 = vsel %vm4354_vm6, %v2266_v30, 0.0  ;;  %vm5201_vm6 = vmmov %vm5200_vm2 }
 0x255   :  { %v2221_v0 = vsel %vm5198_vm5, %v2199_v27, %v2200_v4  ;;  %v2222_v51 = vsel %vm5199_vm4, %v2198_v28, %v2199_v27  ;;  %v3486_v12 = vpop.f32.mrb[70].mxu1  ;;  %v2298_v20 = vsel %vm5200_vm2, %v2282_v43, -inf  ;;  %vm5205_vm5 = vmmov %vm5196_vm0 }
 0x256   :  { %v2267_v18 = vmax.f32 %v2251_v33, 0.0  ;;  %v2268_v60 = vmax.f32 %v2252_v53, 0.0  ;;  %v2230_v56 = vadd.f32 %v2222_v51, %v4866_v31  ;;  %v2231_v52 = vadd.f32 %v2221_v0, %v4868_v16  ;;  %v2146_v38 = vpop.f32.mrb[71].mxu1  ;;  %vm5206_vm4 = vmmov %vm5196_vm0 }
 0x257   :  { %v2202_v10 = vrot.slane %v3486_v12, 2  ;;  %v2201_v25 = vrot.slane %v2146_v38, 2 }
 0x258   :  { %v2283_v55 = vsel %vm4358_vm8, %v2267_v18, 0.0  ;;  %v2253_v7 = vadd.f32 %v4936_v14, %v2230_v56  ;;  %v2254_v15 = vadd.f32 %v4936_v14, %v2231_v52  ;;  %v2284_v46 = vsel %vm4363_vm9, %v2268_v60, 0.0  ;;  %vm5203_vm8 = vmmov %vm5200_vm2 }
 0x259   :  { %v2299_v28 = vsel %vm5201_vm6, %v2283_v55, -inf  ;;  %v2219_v31 = vsel %vm5196_vm0, %v2201_v25, %v2202_v10  ;;  %v2220_v16 = vsel %vm5202_vm7, %v2200_v4, %v2201_v25  ;;  %v3489_v8 = vpop.f32.mrb[72].mxu1  ;;  %v2307_v45 = vsel %vm5203_vm8, %v2284_v46, -inf  ;;  %vm5204_vm9 = vmmov %vm5200_vm2 }
 0x25a   :  { %v2300_v62 = vmax.f32 %v2298_v20, %v2299_v28  ;;  %v2269_v9 = vmax.f32 %v2253_v7, 0.0  ;;  %v2270_v61 = vmax.f32 %v2254_v15, 0.0  ;;  %v2232_v23 = vadd.f32 %v2220_v16, %v4876_v32  ;;  %v2156_v36 = vpop.f32.mrb[73].mxu1  ;;  %vm5213_vm7 = vmmov %vm5201_vm6 }
 0x25b   :  { %v2233_v6 = vadd.f32 %v2219_v31, %v4878_v47  ;;  %v2204_v30 = vrot.slane %v3489_v8, 2  ;;  %v2203_v1 = vrot.slane %v2156_v36, 2  ;;  %vm5215_vm8 = vmmov %vm5196_vm0 }
 0x25c   :  { %v2285_v3 = vsel %vm4375_vm10, %v2269_v9, 0.0  ;;  %v2255_v57 = vadd.f32 %v4936_v14, %v2232_v23  ;;  %v2286_v47 = vsel %vm4379_vm11, %v2270_v61, 0.0  ;;  %v2301_v56 = vrot.slane %v2300_v62, 4  ;;  %vm5207_vm10 = vmmov %vm5200_vm2 }
 0x25d   :  { %v2308_v4 = vsel %vm5204_vm9, %v2285_v3, -inf  ;;  %v2256_v27 = vadd.f32 %v4936_v14, %v2233_v6  ;;  %v2217_v33 = vsel %vm5205_vm5, %v2203_v1, %v2204_v30  ;;  %v3492_v32 = vpop.f32.mrb[74].mxu1  ;;  %v2218_v29 = vsel %vm5206_vm4, %v2202_v10, %v2203_v1  ;;  %vm5208_vm11 = vmmov %vm5200_vm2 }
 0x25e   :  { %v2309_v53 = vmax.f32 %v2307_v45, %v2308_v4  ;;  %v2271_v43 = vmax.f32 %v2255_v57, 0.0  ;;  %v2166_v0 = vpop.f32.mrb[75].mxu1  ;;  %v2234_v12 = vadd.f32 %v2218_v29, %v4886_v2  ;;  %v2235_v18 = vadd.f32 %v2217_v33, %v4888_v13  ;;  %vm5209_vm2 = vmmov %vm5196_vm0 }
 0x25f   :  { %v2272_v51 = vmax.f32 %v2256_v27, 0.0  ;;  %v2206_v60 = vrot.slane %v3492_v32, 2  ;;  %v2205_v38 = vrot.slane %v2166_v0, 2  ;;  %v2316_v19 = vsel %vm5207_vm10, %v2286_v47, -inf  ;;  %vm5217_vm9 = vmmov %vm5196_vm0 }
 0x260   :  { %v2287_v52 = vsel %vm4406_vm12, %v2271_v43, 0.0  ;;  %v2257_v20 = vadd.f32 %v4936_v14, %v2234_v12  ;;  %v2258_v10 = vadd.f32 %v4936_v14, %v2235_v18  ;;  %vm5210_vm12 = vmmov %vm5196_vm0  ;;  %v2302_v31 = vmax.f32 %v2300_v62, %v2301_v56 }
 0x261   :  { %v2317_v25 = vsel %vm5208_vm11, %v2287_v52, -inf  ;;  %v3495_v55 = vpop.f32.mrb[76].mxu1  ;;  %v2288_v2 = vsel %vm4421_vm13, %v2272_v51, 0.0  ;;  %v2215_v50 = vsel %vm5209_vm2, %v2205_v38, %v2206_v60  ;;  %v2216_v46 = vsel %vm5210_vm12, %v2204_v30, %v2205_v38  ;;  %vm5211_vm13 = vmmov %vm5201_vm6 }
 0x262   :  { %v2318_v7 = vmax.f32 %v2316_v19, %v2317_v25  ;;  %v2176_v15 = vpop.f32.mrb[77].mxu1  ;;  %v2273_v13 = vmax.f32 %v2257_v20, 0.0  ;;  %v2236_v28 = vadd.f32 %v2216_v46, %v4896_v35  ;;  %v2274_v16 = vmax.f32 %v2258_v10, 0.0  ;;  %vm5219_vm5 = vmmov %vm5201_vm6 }
 0x263   :  { %v2237_v9 = vadd.f32 %v2215_v50, %v4898_v17  ;;  %v2310_v23 = vrot.slane %v2309_v53, 4  ;;  %v2325_v54 = vsel %vm5201_vm6, %v2288_v2, -inf  ;;  %v2208_v6 = vrot.slane %v3495_v55, 2  ;;  %vm5220_vm4 = vmmov %vm5219_vm5 }
 0x264   :  { %v2289_v8 = vsel %vm4444_vm14, %v2273_v13, 0.0  ;;  %v2319_v3 = vrot.slane %v2318_v7, 4  ;;  %v2259_v30 = vadd.f32 %v4936_v14, %v2236_v28  ;;  %v2207_v62 = vrot.slane %v2176_v15, 2  ;;  %vm5212_vm14 = vmmov %vm5196_vm0 }
 0x265   :  { %v3498_v61 = vpop.f32.mrb[78].mxu1  ;;  %v2326_v36 = vsel %vm5211_vm13, %v2289_v8, -inf  ;;  %v2260_v35 = vadd.f32 %v4936_v14, %v2237_v9  ;;  %v2303_v11 = vrot.slane %v2302_v31, 2  ;;  %v2290_v17 = vsel %vm4461_vm15, %v2274_v16, 0.0  ;;  %vm5214_vm15 = vmmov %vm5201_vm6 }
 0x266   :  { %v2186_v1 = vpop.f32.mrb[79].mxu1  ;;  %v2327_v57 = vmax.f32 %v2325_v54, %v2326_v36  ;;  %v2210_v45 = vrot.slane %v3498_v61, 2  ;;  %v2275_v27 = vmax.f32 %v2259_v30, 0.0  ;;  %v2213_v32 = vsel %vm5212_vm14, %v2207_v62, %v2208_v6  ;;  %vm5223_vm2 = vmmov %vm5220_vm4 }
 0x267   :  { %v2276_v33 = vmax.f32 %v2260_v35, 0.0  ;;  %v2214_v47 = vsel %vm5196_vm0, %v2206_v60, %v2207_v62  ;;  %v2209_v43 = vrot.slane %v2186_v1, 2  ;;  %v2311_v29 = vmax.f32 %v2309_v53, %v2310_v23  ;;  %vm5225_vm6 = vmmov %vm5223_vm2 }
 0x268   :  { %v2328_v4 = vrot.slane %v2327_v57, 4  ;;  %v2320_v0 = vmax.f32 %v2318_v7, %v2319_v3  ;;  %v2291_v51 = vsel %vm4489_vm1, %v2275_v27, 0.0  ;;  %v2238_v12 = vadd.f32 %v2214_v47, %v4906_v48  ;;  %vm5216_vm1 = vmmov %vm5196_vm0 }
 0x269   :  { %v2334_v24 = vsel %vm5213_vm7, %v2290_v17, -inf  ;;  %v2335_v18 = vsel %vm5214_vm15, %v2291_v51, -inf  ;;  %v2239_v56 = vadd.f32 %v2213_v32, %v4908_v49  ;;  %v2226_v52 = vsel %vm5215_vm8, %v2210_v45, %v2195_v40  ;;  %vm5227_vm14 = vmmov %vm5223_vm2 }
 0x26a   :  { %v2329_v60 = vmax.f32 %v2327_v57, %v2328_v4  ;;  %v2336_v38 = vmax.f32 %v2334_v24, %v2335_v18  ;;  %v2261_v53 = vadd.f32 %v4936_v14, %v2238_v12  ;;  %v2242_v34 = vadd.f32 %v2226_v52, %v4916_v22  ;;  %vm5228_vm0 = vmmov %vm5223_vm2 }
 0x26b   :  { %v2292_v48 = vsel %vm4499_vm3, %v2276_v33, 0.0  ;;  %v2262_v19 = vadd.f32 %v4936_v14, %v2239_v56  ;;  %v2211_v25 = vsel %vm5216_vm1, %v2209_v43, %v2210_v45  ;;  %v2212_v49 = vsel %vm5217_vm9, %v2208_v6, %v2209_v43 }
 0x26c   :  { %v2337_v39 = vrot.slane %v2336_v38, 4  ;;  %v2277_v20 = vmax.f32 %v2261_v53, 0.0  ;;  %v2265_v40 = vadd.f32 %v4936_v14, %v2242_v34  ;;  %v2240_v10 = vadd.f32 %v2212_v49, %v4922_v42 }
 0x26d   :  { %v2312_v55 = vrot.slane %v2311_v29, 2  ;;  %v2321_v7 = vrot.slane %v2320_v0, 2  ;;  %v2278_v22 = vmax.f32 %v2262_v19, 0.0  ;;  %v2241_v59 = vadd.f32 %v2211_v25, %v4924_v63 }
 0x26e   :  { %v2338_v15 = vmax.f32 %v2336_v38, %v2337_v39  ;;  %vm5218_vm3 = vnez %v5150_v26  ;;  %v2281_v13 = vmax.f32 %v2265_v40, 0.0  ;;  %v2263_v50 = vadd.f32 %v4936_v14, %v2240_v10 }
 0x26f   :  { %v2293_v2 = vsel %vm5218_vm3, %v2277_v20, 0.0  ;;  %v2330_v41 = vrot.slane %v2329_v60, 2  ;;  %v2343_v46 = vsel %vm5219_vm5, %v2292_v48, -inf  ;;  %v2264_v16 = vadd.f32 %v4936_v14, %v2241_v59 }
 0x270   :  { %v2344_v28 = vsel %vm5220_vm4, %v2293_v2, -inf  ;;  %vm5221_vm10 = vnez %v5152_v37  ;;  %vm5222_vm11 = vnez %v5158_v5  ;;  %v2279_v9 = vmax.f32 %v2263_v50, 0.0  ;;  %vm5229_vm4 = vmmov %vm5228_vm0  ;;  %v2917_v50 = vld [vmem:[%s5114_s5 + $0x20] sm:$0xff] }
 0x271   :  { %v2294_v42 = vsel %vm5221_vm10, %v2278_v22, 0.0  ;;  %v2345_v8 = vmax.f32 %v2343_v46, %v2344_v28  ;;  %v2297_v63 = vsel %vm5222_vm11, %v2281_v13, 0.0  ;;  %v2304_v26 = vmax.f32 %v2302_v31, %v2303_v11  ;;  %vm5230_vm10 = vmmov %vm5228_vm0  ;;  %v2500_v46 = vld [vmem:[%s5114_s5] sm:$0xff] }
 0x272   :  { %v2313_v61 = vmax.f32 %v2311_v29, %v2312_v55  ;;  %v2280_v23 = vmax.f32 %v2264_v16, 0.0  ;;  %v2339_v54 = vrot.slane %v2338_v15, 2  ;;  %v2322_v36 = vmax.f32 %v2320_v0, %v2321_v7  ;;  %v2501_v16 = vld [vmem:[%s5114_s5 + $0x8] sm:$0xff]  ;;  %vm5231_vm11 = vmmov %vm5228_vm0 }
 0x273   :  { %v2346_v6 = vrot.slane %v2345_v8, 4  ;;  %v2362_v1 = vsel %vm5223_vm2, %v2297_v63, -inf  ;;  %vm5224_vm12 = vnez %v5154_v58  ;;  %v2352_v14 = vsel %vm5225_vm6, %v2294_v42, -inf  ;;  %vm5232_vm2 = vmmov %vm5228_vm0 }
 0x274   :  { %v2295_v3 = vsel %vm5224_vm12, %v2279_v9, 0.0  ;;  %vm5226_vm13 = vnez %v5156_v44  ;;  %v2331_v57 = vmax.f32 %v2329_v60, %v2330_v41  ;;  %v2340_v35 = vmax.f32 %v2338_v15, %v2339_v54  ;;  %v2918_v41 = vld [vmem:[%s5114_s5 + $0x28] sm:$0xff]  ;;  %vm5233_vm6 = vmmov %vm5228_vm0 }
 0x275   :  { %v2296_v37 = vsel %vm5226_vm13, %v2280_v23, 0.0  ;;  %v2353_v5 = vsel %vm5227_vm14, %v2295_v3, -inf  ;;  %v2347_v62 = vmax.f32 %v2345_v8, %v2346_v6  ;;  %v2314_v45 = vrot.slane %v2313_v61, 1  ;;  %vm5234_vm13 = vmmov %vm5228_vm0 }
 0x276   :  { %v2354_v30 = vmax.f32 %v2352_v14, %v2353_v5  ;;  %v2361_v31 = vsel %vm5228_vm0, %v2296_v37, -inf  ;;  %v2323_v17 = vrot.slane %v2322_v36, 1  ;;  %v2305_v58 = vrot.slane %v2304_v26, 1 }
 0x277   :  { %v2363_v11 = vmax.f32 %v2361_v31, %v2362_v1  ;;  %v2348_v4 = vrot.slane %v2347_v62, 2  ;;  %v2332_v33 = vrot.slane %v2331_v57, 1  ;;  %v2341_v47 = vrot.slane %v2340_v35, 1 }
 0x278   :  { %v2355_v27 = vrot.slane %v2354_v30, 4  ;;  %v2315_v29 = vmax.f32 %v2313_v61, %v2314_v45  ;;  %v2324_v51 = vmax.f32 %v2322_v36, %v2323_v17  ;;  %vm2378_vm7 = vcmask 1041409  }
 0x279   :  { %v2364_v32 = vrot.slane %v2363_v11, 4  ;;  %v2349_v43 = vmax.f32 %v2347_v62, %v2348_v4  ;;  %v2306_v18 = vmax.f32 %v2304_v26, %v2305_v58  ;;  %v2333_v56 = vmax.f32 %v2331_v57, %v2332_v33 }
 0x27a   :  { %v2356_v44 = vmax.f32 %v2354_v30, %v2355_v27  ;;  %vm2380_vm15 = vcmask 1042434   ;;  %v2342_v60 = vmax.f32 %v2340_v35, %v2341_v47  ;;  %vm2382_vm8 = vcmask 1043459  }
 0x27b   :  { %v2365_v0 = vmax.f32 %v2363_v11, %v2364_v32  ;;  %v2350_v12 = vrot.slane %v2349_v43, 1  ;;  %v2379_v48 = vsel %vm2378_vm7, %v2315_v29, %v2306_v18  ;;  %vm2384_vm1 = vcmask 1044484  }
 0x27c   :  { %v2357_v24 = vrot.slane %v2356_v44, 2  ;;  %v2381_v25 = vsel %vm2380_vm15, %v2324_v51, %v2379_v48  ;;  %vm2386_vm9 = vcmask 1045509   ;;  %vm2388_vm3 = vcmask 1046534  }
 0x27d   :  { %v2366_v52 = vrot.slane %v2365_v0, 2  ;;  %v2351_v53 = vmax.f32 %v2349_v43, %v2350_v12  ;;  %v2383_v39 = vsel %vm2382_vm8, %v2333_v56, %v2381_v25  ;;  %vm2390_vm5 = vcmask 1047559  }
 0x27e   :  { %v2358_v38 = vmax.f32 %v2356_v44, %v2357_v24  ;;  %v2385_v40 = vsel %vm2384_vm1, %v2342_v60, %v2383_v39  ;;  %v3657_v13 = vmov 0.0|0.0   ;;  %v3622_v28 = vpack.c.bf16 %v2918_v41, %v2917_v50  ;;  %v2503_v50 = vld [vmem:[%s5114_s5 + $0x18] sm:$0xff] }
 0x27f   :  { %v2367_v34 = vmax.f32 %v2365_v0, %v2366_v52  ;;  %v2387_v55 = vsel %vm2386_vm9, %v2351_v53, %v2385_v40  ;;  %3621 = vmatprep.subr.bf16.mxu0 %v3657_v13  ;;  %3627 = vmatprep.subr.bf16.mxu1 %v3657_v13  ;;  %v3628_v42 = vpack.c.bf16 %v2501_v16, %v2500_v46  ;;  %vm3658_vm12 = vmmov 0  }
 0x280   :  { %v2359_v19 = vrot.slane %v2358_v38, 1  ;;  %3623 = vmatpush3.bf16.msra.mxu0 %v3622_v28  ;;  %3507 = vmatprep.mubr.msk.f32.mxu0 %vm3658_vm12, %v3656_v21 }
 0x281   :  { %v2368_v49 = vrot.slane %v2367_v34, 1  ;;  %3629 = vmatpush3.bf16.msra.mxu1 %v3628_v42  ;;  %3624 = vmatprep.subr.bf16.mxu0 %v3657_v13 }
 0x282   :  { %v2360_v20 = vmax.f32 %v2358_v38, %v2359_v19  ;;  %3630 = vmatprep.subr.bf16.mxu1 %v3657_v13  ;;  %3518 = vmatprep.mubr.msk.f32.mxu1 %vm3658_vm12, %v3656_v21 }
 0x283   :  { %v2369_v10 = vmax.f32 %v2367_v34, %v2368_v49 }
 0x284   :  { %v2389_v7 = vsel %vm2388_vm3, %v2360_v20, %v2387_v55 }
 0x285   :  { %v2391_v22 = vsel %vm2390_vm5, %v2369_v10, %v2389_v7 }
 0x286   :  { %v2394_v59 = vsel %vm5229_vm4, %v2391_v22, -inf  ;;  %v2393_v15 = vrot.slane %v2391_v22, 2 }
 0x287   :  { %2395 = vmax.xlane.f32.xlu0 %v2394_v59  ;;  %v2919_v59 = vld [vmem:[%s5114_s5 + $0x30] sm:$0xff] }
 0x288   :  { %v2397_v2 = vsel %vm5230_vm10, %v2393_v15, -inf }
 0x28b   :  { %2398 = vmax.xlane.f32.xlu0 %v2397_v2  ;;  %v2502_v2 = vld [vmem:[%s5114_s5 + $0x10] sm:$0xff] }
 0x28c   :  { %v3631_v41 = vpack.c.bf16 %v2503_v50, %v2502_v2 }
 0x28e   :  { %3632 = vmatpush3.bf16.msra.mxu1 %v3631_v41 }
 0x314   :  { %v2396_v8 = vpop.xlane.xlu0 %2395 }
 0x318   :  { %v2399_v63 = vpop.xlane.xlu0 %2398 }
 0x319   :  { %v2400_v9 = vmax.f32 %v2396_v8, %v2399_v63 }
 0x31b   :  { %v2402_v26 = vrot.slane %v2400_v9, 1  ;;  %v2403_v61 = vrot.slane %v2400_v9, 2  ;;  %v2404_v23 = vrot.slane %v2400_v9, 3  ;;  %v2405_v54 = vrot.slane %v2400_v9, 4 }
 0x31c   :  { %v2406_v36 = vrot.slane %v2400_v9, 5  ;;  %v2407_v6 = vrot.slane %v2400_v9, 6  ;;  %v2408_v1 = vrot.slane %v2400_v9, 7  ;;  %v2417_v3 = vsub.f32 %v2306_v18, %v2400_v9 }
 0x31d   :  { %v2418_v14 = vsub.f32 %v2315_v29, %v2402_v26  ;;  %v2419_v37 = vsub.f32 %v2324_v51, %v2403_v61  ;;  %v2420_v5 = vsub.f32 %v2333_v56, %v2404_v23  ;;  %v2421_v57 = vsub.f32 %v2342_v60, %v2405_v54 }
 0x31e   :  { %v2422_v30 = vsub.f32 %v2351_v53, %v2406_v36  ;;  %v2423_v31 = vsub.f32 %v2360_v20, %v2407_v6  ;;  %v2425_v35 = vmul.f32 1.442695, %v2417_v3  ;;  %v2424_v62 = vsub.f32 %v2369_v10, %v2408_v1 }
 0x31f   :  { %v2427_v45 = vmul.f32 1.442695, %v2418_v14  ;;  %v2429_v11 = vmul.f32 1.442695, %v2419_v37  ;;  %v2431_v17 = vmul.f32 1.442695, %v2420_v5  ;;  %v2441_v32 = vsub.f32 %v2393_v15, %v2400_v9 }
 0x320   :  { %3636 = vpow2.f32 %v2425_v35  ;;  %v2433_v4 = vmul.f32 1.442695, %v2421_v57  ;;  %v2435_v27 = vmul.f32 1.442695, %v2422_v30  ;;  %v2437_v58 = vmul.f32 1.442695, %v2423_v31 }
 0x321   :  { %3638 = vpow2.f32 %v2427_v45  ;;  %v2439_v33 = vmul.f32 1.442695, %v2424_v62  ;;  %v2442_v47 = vmul.f32 1.442695, %v2441_v32  ;;  %v2920_v15 = vld [vmem:[%s5114_s5 + $0x38] sm:$0xff] }
 0x322   :  { %3640 = vpow2.f32 %v2429_v11  ;;  %v3625_v13 = vpack.c.bf16 %v2920_v15, %v2919_v59 }
 0x323   :  { %3642 = vpow2.f32 %v2431_v17 }
 0x324   :  { %3644 = vpow2.f32 %v2433_v4  ;;  %3626 = vmatpush3.bf16.msra.mxu0 %v3625_v13 }
 0x325   :  { %3646 = vpow2.f32 %v2435_v27 }
 0x326   :  { %3648 = vpow2.f32 %v2437_v58 }
 0x327   :  { %3650 = vpow2.f32 %v2439_v33 }
 0x328   :  { %3652 = vpow2.f32 %v2442_v47 }
 0x32a   :  { %v3637_v43 = vpop.eup %3636 }
 0x32b   :  { %v3639_v44 = vpop.eup %3638 }
 0x32c   :  { %v3641_v29 = vpop.eup %3640  ;;  %v2452_v0 = vrot.slane %v3639_v44, 7 }
 0x32d   :  { %v3643_v51 = vpop.eup %3642  ;;  %v2454_v12 = vrot.slane %v3641_v29, 6 }
 0x32e   :  { %v3645_v24 = vpop.eup %3644  ;;  %v2453_v18 = vsel %vm2378_vm7, %v2452_v0, %v3637_v43  ;;  %v2456_v56 = vrot.slane %v3643_v51, 5 }
 0x32f   :  { %v3647_v52 = vpop.eup %3646  ;;  %v2455_v60 = vsel %vm2380_vm15, %v2454_v12, %v2453_v18  ;;  %v2458_v38 = vrot.slane %v3645_v24, 4 }
 0x330   :  { %v3649_v53 = vpop.eup %3648  ;;  %v2457_v34 = vsel %vm2382_vm8, %v2456_v56, %v2455_v60  ;;  %v2460_v48 = vrot.slane %v3647_v52, 3 }
 0x331   :  { %v3651_v19 = vpop.eup %3650  ;;  %v2459_v25 = vsel %vm2384_vm1, %v2458_v38, %v2457_v34  ;;  %v2462_v49 = vrot.slane %v3649_v53, 2 }
 0x332   :  { %v2461_v39 = vsel %vm2386_vm9, %v2460_v48, %v2459_v25  ;;  %v2464_v20 = vrot.slane %v3651_v19, 1  ;;  %v3653_v7 = vpop.eup %3652 }
 0x333   :  { %v2463_v40 = vsel %vm2388_vm3, %v2462_v49, %v2461_v39  ;;  %v2470_v22 = vsel %vm5232_vm2, %v3653_v7, 0.0 }
 0x334   :  { %v2465_v10 = vsel %vm2390_vm5, %v2464_v20, %v2463_v40 }
 0x335   :  { %v2467_v55 = vsel %vm5231_vm11, %v2465_v10, 0.0 }
 0x336   :  { %2468 = vadd.xlane.f32.xlu1 %v2467_v55 }
 0x33a   :  { %2471 = vadd.xlane.f32.xlu1 %v2470_v22 }
 0x3c3   :  { %v2469_v46 = vpop.xlane.xlu1 %2468 }
 0x3c7   :  { %v2472_v28 = vpop.xlane.xlu1 %2471 }
 0x3c8   :  { %v2473_v16 = vadd.f32 %v2472_v28, %v2469_v46 }
 0x3ca   :  { %3654 = vrcp.f32 %v2473_v16 }
 0x3d4   :  { %v3655_v42 = vpop.eup %3654 }
 0x3d5   :  { %v2504_v8 = vmul.f32 %v3655_v42, %v3653_v7  ;;  %v2477_v63 = vrot.slane %v3655_v42, 1  ;;  %v2478_v9 = vrot.slane %v3655_v42, 2  ;;  %v2479_v26 = vrot.slane %v3655_v42, 3 }
 0x3d6   :  { %v2480_v61 = vrot.slane %v3655_v42, 4  ;;  %v2481_v23 = vrot.slane %v3655_v42, 5  ;;  %v2482_v54 = vrot.slane %v3655_v42, 6  ;;  %v2483_v36 = vrot.slane %v3655_v42, 7 }
 0x3d7   :  { %3508 = vmatmul.mubr.msk.f32.vlgmr.msra.gmra.mrb[80].mxu0 %vm5233_vm6, %v2504_v8  ;;  %v2493_v6 = vmul.f32 %v3639_v44, %v2477_v63  ;;  %v2494_v21 = vmul.f32 %v3641_v29, %v2478_v9  ;;  %v2495_v1 = vmul.f32 %v3643_v51, %v2479_v26  ;;  %v2492_v14 = vmul.f32 %v3655_v42, %v3637_v43  ;;  %v2923_v51 = vld [vmem:[%s5115_s6] ss:$0 sm:$0xff] }
 0x3d8   :  { %v2496_v3 = vmul.f32 %v3645_v24, %v2480_v61  ;;  %v2497_v37 = vmul.f32 %v3647_v52, %v2481_v23  ;;  %v2498_v30 = vmul.f32 %v3649_v53, %v2482_v54  ;;  %v2499_v31 = vmul.f32 %v3651_v19, %v2483_v36 }
 0x3d9   :  { %v2591_v5 = vrot.slane %v2493_v6, 7  ;;  %v2593_v57 = vrot.slane %v2494_v21, 6  ;;  %v2595_v62 = vrot.slane %v2495_v1, 5 }
 0x3da   :  { %v2597_v11 = vrot.slane %v2496_v3, 4  ;;  %v2599_v4 = vrot.slane %v2497_v37, 3  ;;  %v2601_v58 = vrot.slane %v2498_v30, 2  ;;  %v2603_v32 = vrot.slane %v2499_v31, 1 }
 0x3db   :  { %v2592_v35 = vsel %vm2378_vm7, %v2591_v5, %v2492_v14 }
 0x3dc   :  { %v2594_v45 = vsel %vm2380_vm15, %v2593_v57, %v2592_v35 }
 0x3dd   :  { %v2596_v17 = vsel %vm2382_vm8, %v2595_v62, %v2594_v45 }
 0x3de   :  { %v2598_v27 = vsel %vm2384_vm1, %v2597_v11, %v2596_v17 }
 0x3df   :  { %v2600_v33 = vsel %vm2386_vm9, %v2599_v4, %v2598_v27 }
 0x3e0   :  { %v2602_v47 = vsel %vm2388_vm3, %v2601_v58, %v2600_v33 }
 0x3e1   :  { %v2604_v43 = vsel %vm2390_vm5, %v2603_v32, %v2602_v47 }
 0x3e2   :  { %3519 = vmatmul.mubr.msk.f32.vlgmr.msra.gmra.mrb[80].mxu1 %vm5234_vm13, %v2604_v43 }
 0x4aa   :  { %v2579_v44 = vpop.f32.mrb[80].mxu0 }
 0x4ab   :  { %v3509_v29 = vpop.f32.mrb[81].mxu0 }
 0x4b5   :  { %v2673_v0 = vpop.f32.mrb[80].mxu1 }
 0x4b6   :  { %v2674_v12 = vadd.f32 %v2673_v0, %v2579_v44  ;;  %v3520_v24 = vpop.f32.mrb[81].mxu1 }
 0x4b8   :  { %v2684_v18 = vadd.f32 %v2923_v51, %v2674_v12 }
 0x4ba   :  { %2685 = vst [vmem:[%s5116_s7] sm:$0xff] %v2684_v18 }

</bundles_post_ra>
